<compile_context>
chip_gen: v7x
topology: tpu7x:2x2x1
jax: 0.10.0
libtpu: 0.0.40
codegen_flags: <defaults>
</compile_context>

<pallas_src>
import functools

import jax
import jax.numpy as jnp
from jax.experimental import pallas as pl
from jax.experimental.pallas import tpu as pltpu

_LANE = 128      # lane width  (last dim)
_SUBLANE = 8     # sublane width (second-to-last dim)


def _round_up(n, m):
    return ((n + m - 1) // m) * m


# ----------------------------------------------------------------------------
# Fused kernel: layer-0 input projection + wavefront recurrence over all
# layers + final fc.  No grid — everything fits comfortably in VMEM at these
# sizes (asserted in the wrapper).
# ----------------------------------------------------------------------------
def _wavefront_rnn_fc_kernel(num_layers, seq_len, batch_p, hp,
                             x_ref, wih0_ref, wbig_ref, bbig_ref,
                             fcw_ref, fcb_ref, out_ref, xproj_ref):
    """Ref layout:
         x_ref     (S*Bp, Din_p)        time-major flattened input
         wih0_ref  (Din_p, Hp)          layer-0 input weight (transposed)
         wbig_ref  (L*Hp, L*Hp)         block-banded stacked weights:
                                        block (l,l)   = W_hh_l^T
                                        block (l-1,l) = W_ih_l^T   (l >= 1)
         bbig_ref  (1, L*Hp)            concatenated b_ih+b_hh per layer
         fcw_ref   (Hp, Out_p), fcb_ref (1, Out_p)
         out_ref   (Bp, Out_p)          output
         xproj_ref (S*Bp, Hp)           VMEM scratch: hoisted x @ W_ih0^T
    """
    # (1) Hoisted layer-0 input projection: one fat parallel MXU matmul over
    #     the whole (time, batch) axis — no sequential dependency.  Bias is
    #     NOT added here (it lives in bbig and is added once in the wavefront).
    xproj_ref[...] = jnp.dot(x_ref[...], wih0_ref[...],
                             preferred_element_type=jnp.float32)

    lhp = num_layers * hp
    n_diag = seq_len + num_layers - 1

    def step(d, s):
        # One (Bp, L*Hp) x (L*Hp, L*Hp) matmul advances EVERY layer by one
        # wavefront diagonal: layer l processes timestep t = d - l.
        # wbig_ref is read *inside* the loop (per-iteration operand), so the
        # stacked weight is never a loop-carried value pinned in vregs.
        pre = jnp.dot(s, wbig_ref[...],
                      preferred_element_type=jnp.float32) + bbig_ref[...]

        # Layer-0 gets its precomputed input projection injected.  When layer 0
        # is already past the end of the sequence (d >= S) the read index is
        # clamped; the result is discarded by the activity mask below.
        row = pl.multiple_of(jnp.minimum(d, seq_len - 1) * batch_p, batch_p)
        inj = xproj_ref[pl.ds(row, batch_p), :]

        blocks = []
        for l in range(num_layers):                      # static, small L
            blk = pre[:, l * hp:(l + 1) * hp]
            if l == 0:
                blk = blk + inj
            t_l = d - l
            active = jnp.logical_and(t_l >= 0, t_l < seq_len)
            # Inactive layers hold their state: before activation that keeps
            # the zero initial hidden (hx=None), after the last timestep it
            # preserves h_l^{S-1} for the layer above / the final fc.
            blocks.append(jnp.where(active, jnp.tanh(blk),
                                    s[:, l * hp:(l + 1) * hp]))
        return blocks[0] if num_layers == 1 else jnp.concatenate(blocks, axis=1)

    s0 = jnp.zeros((batch_p, lhp), jnp.float32)
    # Short serial chain -> full unroll; deeper chains unroll by 8 so the
    # scheduler can co-issue across scalar / vex / EUP slots.
    unroll = True if n_diag <= 16 else 8
    s_fin = jax.lax.fori_loop(0, n_diag, step, s0, unroll=unroll)

    # (2) Final fc on the last layer's last-timestep hidden state (outs[-1]).
    h_last = s_fin[:, (num_layers - 1) * hp:]
    out_ref[...] = (
        jnp.dot(h_last, fcw_ref[...], preferred_element_type=jnp.float32)
        + fcb_ref[...]
    ).astype(out_ref.dtype)


# ----------------------------------------------------------------------------
# Parameters (PyTorch-style init, stored transposed with combined bias)
# ----------------------------------------------------------------------------
def init_params(key, input_size, hidden_size, num_layers, output_size, bias=True):
    k = 1.0 / float(hidden_size) ** 0.5
    layers = []
    for l in range(num_layers):
        din = input_size if l == 0 else hidden_size
        key, k1, k2, k3, k4 = jax.random.split(key, 5)
        wih = jax.random.uniform(k1, (hidden_size, din), jnp.float32, -k, k)
        whh = jax.random.uniform(k2, (hidden_size, hidden_size), jnp.float32, -k, k)
        b_ih = (jax.random.uniform(k3, (hidden_size,), jnp.float32, -k, k)
                if bias else jnp.zeros((hidden_size,), jnp.float32))
        b_hh = (jax.random.uniform(k4, (hidden_size,), jnp.float32, -k, k)
                if bias else jnp.zeros((hidden_size,), jnp.float32))
        layers.append((wih.T, whh.T, b_ih + b_hh))
    key, kf1, kf2 = jax.random.split(key, 3)
    fc_w = jax.random.uniform(kf1, (output_size, hidden_size), jnp.float32, -k, k)
    fc_b = jax.random.uniform(kf2, (output_size,), jnp.float32, -k, k)
    # NOTE: att_fc exists in the PyTorch __init__ but is unused in forward.
    return {"layers": layers, "fc_w_t": fc_w.T, "fc_b": fc_b}


# ----------------------------------------------------------------------------
# Forward pass
# ----------------------------------------------------------------------------
@jax.jit
def rnn_model_forward(x, params):
    """x: (batch, seq, input_size) -> (batch, output_size)
    (or (output_size,) when batch == 1, matching PyTorch's .squeeze())."""
    B, S, Din = x.shape
    layers = params["layers"]
    L = len(layers)
    H = layers[0][1].shape[0]
    Out = params["fc_b"].shape[0]

    Bp = _round_up(B, _SUBLANE)
    Din_p = _round_up(Din, _LANE)
    Hp = _round_up(H, _LANE)
    Out_p = _round_up(Out, _LANE)

    # time-major, zero-padded, flattened to (S*Bp, Din_p): every per-timestep
    # slice is a clean aligned (Bp, :) window and every store is lane-dense.
    xs = jnp.transpose(x, (1, 0, 2)).astype(jnp.float32)           # (S, B, Din)
    xs = jnp.pad(xs, ((0, 0), (0, Bp - B), (0, Din_p - Din)))
    xs = xs.reshape(S * Bp, Din_p)

    # Layer-0 input weight (used by the hoisted projection).
    wih0_t, _, _ = layers[0]
    wih0_p = jnp.pad(wih0_t, ((0, Din_p - Din), (0, Hp - H)))

    # Block-banded stacked weight + concatenated bias for the wavefront.
    wbig = jnp.zeros((L * Hp, L * Hp), jnp.float32)
    bbig_parts = []
    for l, (wih_t, whh_t, b) in enumerate(layers):
        whh_p = jnp.pad(whh_t, ((0, Hp - H), (0, Hp - H)))
        wbig = wbig.at[l * Hp:(l + 1) * Hp, l * Hp:(l + 1) * Hp].set(whh_p)
        if l > 0:                                   # layer-l input weight is (H, H)
            wih_p = jnp.pad(wih_t, ((0, Hp - H), (0, Hp - H)))
            wbig = wbig.at[(l - 1) * Hp:l * Hp, l * Hp:(l + 1) * Hp].set(wih_p)
        bbig_parts.append(jnp.pad(b.reshape(1, H), ((0, 0), (0, Hp - H))))
    bbig = jnp.concatenate(bbig_parts, axis=1)       # (1, L*Hp)

    fcw_p = jnp.pad(params["fc_w_t"], ((0, Hp - H), (0, Out_p - Out)))
    fcb_p = jnp.pad(params["fc_b"].reshape(1, Out), ((0, 0), (0, Out_p - Out)))

    # Explicit VMEM budget (review item): inputs + scratch + output, asserted
    # against a conservative per-TC budget (v7x has only 64 MiB physical).
    resident_elems = (xs.size + wih0_p.size + wbig.size + bbig.size
                      + fcw_p.size + fcb_p.size + S * Bp * Hp + Bp * Out_p)
    vmem_need = 4 * int(resident_elems)
    assert vmem_need < 40 * 2 ** 20, (
        f"VMEM-resident working set {vmem_need} B too large; chunk the sequence")
    vmem_limit = int(min(max(4 * vmem_need, 8 * 2 ** 20), 64 * 2 ** 20))

    out_p = pl.pallas_call(
        functools.partial(_wavefront_rnn_fc_kernel, L, S, Bp, Hp),
        out_shape=jax.ShapeDtypeStruct((Bp, Out_p), jnp.float32),
        scratch_shapes=[pltpu.VMEM((S * Bp, Hp), jnp.float32)],
        compiler_params=pltpu.CompilerParams(vmem_limit_bytes=vmem_limit),
    )(xs, wih0_p, wbig, bbig, fcw_p, fcb_p)

    out = out_p[:B, :Out]
    # PyTorch: outs[-1].squeeze() before fc -> batch==1 yields a 1-D output.
    return out[0] if B == 1 else out


# ----------------------------------------------------------------------------
# Pure-JAX reference (mirrors the PyTorch forward) for a correctness check.
# ----------------------------------------------------------------------------
def _reference_forward(x, params):
    xs = jnp.transpose(x, (1, 0, 2)).astype(jnp.float32)  # (S, B, Din)
    S = xs.shape[0]
    for (wih_t, whh_t, b) in params["layers"]:
        h = jnp.zeros((xs.shape[1], whh_t.shape[0]), jnp.float32)
        outs = []
        for t in range(S):
            h = jnp.tanh(xs[t] @ wih_t + h @ whh_t + b)
            outs.append(h)
        xs = jnp.stack(outs)
    out = xs[-1] @ params["fc_w_t"] + params["fc_b"]
    return out[0] if x.shape[0] == 1 else out


if __name__ == "__main__":
    # small, deterministic example shapes
    batch, seq, input_size = 2, 8, 16
    hidden_size, num_layers, output_size = 32, 2, 10

    key = jax.random.PRNGKey(0)
    key, kx, kp = jax.random.split(key, 3)
    x = jax.random.normal(kx, (batch, seq, input_size), jnp.float32)
    params = init_params(kp, input_size, hidden_size, num_layers, output_size)

    out = rnn_model_forward(x, params)
    out = jax.block_until_ready(out)
    assert out.shape == (batch, output_size), out.shape
    assert jnp.all(jnp.isfinite(out))

    ref = _reference_forward(x, params)
    assert jnp.allclose(out, ref, rtol=1e-5, atol=1e-5), (
        float(jnp.max(jnp.abs(out - ref))))

    print("KERNEL_OK")
</pallas_src>

<mosaic_0001>
module attributes {stable_mosaic.version = 11 : i64} {
  func.func @_wavefront_rnn_fc_kernel(%arg0: memref<64x128xf32, #tpu.memory_space<vmem>>, %arg1: memref<128x128xf32, #tpu.memory_space<vmem>>, %arg2: memref<256x256xf32, #tpu.memory_space<vmem>>, %arg3: memref<1x256xf32, #tpu.memory_space<vmem>>, %arg4: memref<128x128xf32, #tpu.memory_space<vmem>>, %arg5: memref<1x128xf32, #tpu.memory_space<vmem>>, %arg6: memref<8x128xf32, #tpu.memory_space<vmem>>, %arg7: memref<64x128xf32, #tpu.memory_space<vmem>>) attributes {dimension_semantics = [], scalar_prefetch = 0 : i64, scratch_operands = 1 : i64, tpu.core_type = #tpu.core_type<tc>} {
    %c0 = arith.constant 0 : index
    %c0_0 = arith.constant 0 : index
    %0 = vector.load %arg0[%c0, %c0_0] : memref<64x128xf32, #tpu.memory_space<vmem>>, vector<64x128xf32>
    %c0_1 = arith.constant 0 : index
    %c0_2 = arith.constant 0 : index
    %1 = vector.load %arg1[%c0_1, %c0_2] : memref<128x128xf32, #tpu.memory_space<vmem>>, vector<128x128xf32>
    %cst = arith.constant dense<0.000000e+00> : vector<64x128xf32>
    %2 = tpu.matmul %0, %1, %cst {dimension_numbers = #tpu.dot_dimension_numbers<[1], [0], [0], [1], [0, 0, 1, 1], [], []>} : vector<64x128xf32>, vector<128x128xf32>, vector<64x128xf32> -> vector<64x128xf32>
    %c0_3 = arith.constant 0 : index
    %c0_4 = arith.constant 0 : index
    %3 = vector.load %arg7[%c0_3, %c0_4] : memref<64x128xf32, #tpu.memory_space<vmem>>, vector<64x128xf32>
    tpu.vector_store %arg7[%c0_3, %c0_4], %2 {strides = array<i32>} : memref<64x128xf32, #tpu.memory_space<vmem>>, vector<64x128xf32>,
    %cst_5 = arith.constant 0.000000e+00 : f32
    %4 = vector.broadcast %cst_5 : f32 to vector<8x256xf32>
    %c0_i32 = arith.constant 0 : i32
    %c0_6 = arith.constant 0 : index
    %c0_7 = arith.constant 0 : index
    %5 = vector.load %arg2[%c0_6, %c0_7] : memref<256x256xf32, #tpu.memory_space<vmem>>, vector<256x256xf32>
    %cst_8 = arith.constant dense<0.000000e+00> : vector<8x256xf32>
    %6 = tpu.matmul %4, %5, %cst_8 {dimension_numbers = #tpu.dot_dimension_numbers<[1], [0], [0], [1], [0, 0, 1, 1], [], []>} : vector<8x256xf32>, vector<256x256xf32>, vector<8x256xf32> -> vector<8x256xf32>
    %c0_9 = arith.constant 0 : index
    %c0_10 = arith.constant 0 : index
    %7 = vector.load %arg3[%c0_9, %c0_10] : memref<1x256xf32, #tpu.memory_space<vmem>>, vector<1x256xf32>
    %8 = vector.broadcast %7 : vector<1x256xf32> to vector<8x256xf32>
    %9 = arith.addf %6, %8 : vector<8x256xf32>
    %c7_i32 = arith.constant 7 : i32
    %10 = arith.minsi %c0_i32, %c7_i32 : i32
    %c8_i32 = arith.constant 8 : i32
    %11 = arith.muli %10, %c8_i32 : i32
    %12 = tpu.assume_multiple %11, 8 : i32
    %13 = arith.index_cast %12 : i32 to index
    %c0_11 = arith.constant 0 : index
    %14 = vector.load %arg7[%13, %c0_11] : memref<64x128xf32, #tpu.memory_space<vmem>>, vector<8x128xf32>
    %15 = vector.extract_strided_slice %9 {offsets = [0, 0], sizes = [8, 128], strides = [1, 1]} : vector<8x256xf32> to vector<8x128xf32>
    %16 = arith.addf %15, %14 : vector<8x128xf32>
    %c0_i32_12 = arith.constant 0 : i32
    %17 = arith.subi %c0_i32, %c0_i32_12 : i32
    %c0_i32_13 = arith.constant 0 : i32
    %18 = arith.cmpi sge, %17, %c0_i32_13 : i32
    %c8_i32_14 = arith.constant 8 : i32
    %19 = arith.cmpi slt, %17, %c8_i32_14 : i32
    %20 = arith.andi %18, %19 : i1
    %21 = math.tanh %16 : vector<8x128xf32>
    %22 = vector.extract_strided_slice %4 {offsets = [0, 0], sizes = [8, 128], strides = [1, 1]} : vector<8x256xf32> to vector<8x128xf32>
    %23 = arith.select %20, %21, %22 : vector<8x128xf32>
    %24 = vector.extract_strided_slice %9 {offsets = [0, 128], sizes = [8, 128], strides = [1, 1]} : vector<8x256xf32> to vector<8x128xf32>
    %c1_i32 = arith.constant 1 : i32
    %25 = arith.subi %c0_i32, %c1_i32 : i32
    %c0_i32_15 = arith.constant 0 : i32
    %26 = arith.cmpi sge, %25, %c0_i32_15 : i32
    %c8_i32_16 = arith.constant 8 : i32
    %27 = arith.cmpi slt, %25, %c8_i32_16 : i32
    %28 = arith.andi %26, %27 : i1
    %29 = math.tanh %24 : vector<8x128xf32>
    %30 = vector.extract_strided_slice %4 {offsets = [0, 128], sizes = [8, 128], strides = [1, 1]} : vector<8x256xf32> to vector<8x128xf32>
    %31 = arith.select %28, %29, %30 : vector<8x128xf32>
    %32 = tpu.concatenate %23, %31 in 1 : vector<8x128xf32>, vector<8x128xf32> -> vector<8x256xf32>
    %c1_i32_17 = arith.constant 1 : i32
    %c0_18 = arith.constant 0 : index
    %c0_19 = arith.constant 0 : index
    %33 = vector.load %arg2[%c0_18, %c0_19] : memref<256x256xf32, #tpu.memory_space<vmem>>, vector<256x256xf32>
    %cst_20 = arith.constant dense<0.000000e+00> : vector<8x256xf32>
    %34 = tpu.matmul %32, %33, %cst_20 {dimension_numbers = #tpu.dot_dimension_numbers<[1], [0], [0], [1], [0, 0, 1, 1], [], []>} : vector<8x256xf32>, vector<256x256xf32>, vector<8x256xf32> -> vector<8x256xf32>
    %c0_21 = arith.constant 0 : index
    %c0_22 = arith.constant 0 : index
    %35 = vector.load %arg3[%c0_21, %c0_22] : memref<1x256xf32, #tpu.memory_space<vmem>>, vector<1x256xf32>
    %36 = vector.broadcast %35 : vector<1x256xf32> to vector<8x256xf32>
    %37 = arith.addf %34, %36 : vector<8x256xf32>
    %c7_i32_23 = arith.constant 7 : i32
    %38 = arith.minsi %c1_i32_17, %c7_i32_23 : i32
    %c8_i32_24 = arith.constant 8 : i32
    %39 = arith.muli %38, %c8_i32_24 : i32
    %40 = tpu.assume_multiple %39, 8 : i32
    %41 = arith.index_cast %40 : i32 to index
    %c0_25 = arith.constant 0 : index
    %42 = vector.load %arg7[%41, %c0_25] : memref<64x128xf32, #tpu.memory_space<vmem>>, vector<8x128xf32>
    %43 = vector.extract_strided_slice %37 {offsets = [0, 0], sizes = [8, 128], strides = [1, 1]} : vector<8x256xf32> to vector<8x128xf32>
    %44 = arith.addf %43, %42 : vector<8x128xf32>
    %c0_i32_26 = arith.constant 0 : i32
    %45 = arith.subi %c1_i32_17, %c0_i32_26 : i32
    %c0_i32_27 = arith.constant 0 : i32
    %46 = arith.cmpi sge, %45, %c0_i32_27 : i32
    %c8_i32_28 = arith.constant 8 : i32
    %47 = arith.cmpi slt, %45, %c8_i32_28 : i32
    %48 = arith.andi %46, %47 : i1
    %49 = math.tanh %44 : vector<8x128xf32>
    %50 = vector.extract_strided_slice %32 {offsets = [0, 0], sizes = [8, 128], strides = [1, 1]} : vector<8x256xf32> to vector<8x128xf32>
    %51 = arith.select %48, %49, %50 : vector<8x128xf32>
    %52 = vector.extract_strided_slice %37 {offsets = [0, 128], sizes = [8, 128], strides = [1, 1]} : vector<8x256xf32> to vector<8x128xf32>
    %c1_i32_29 = arith.constant 1 : i32
    %53 = arith.subi %c1_i32_17, %c1_i32_29 : i32
    %c0_i32_30 = arith.constant 0 : i32
    %54 = arith.cmpi sge, %53, %c0_i32_30 : i32
    %c8_i32_31 = arith.constant 8 : i32
    %55 = arith.cmpi slt, %53, %c8_i32_31 : i32
    %56 = arith.andi %54, %55 : i1
    %57 = math.tanh %52 : vector<8x128xf32>
    %58 = vector.extract_strided_slice %32 {offsets = [0, 128], sizes = [8, 128], strides = [1, 1]} : vector<8x256xf32> to vector<8x128xf32>
    %59 = arith.select %56, %57, %58 : vector<8x128xf32>
    %60 = tpu.concatenate %51, %59 in 1 : vector<8x128xf32>, vector<8x128xf32> -> vector<8x256xf32>
    %c2_i32 = arith.constant 2 : i32
    %c0_32 = arith.constant 0 : index
    %c0_33 = arith.constant 0 : index
    %61 = vector.load %arg2[%c0_32, %c0_33] : memref<256x256xf32, #tpu.memory_space<vmem>>, vector<256x256xf32>
    %cst_34 = arith.constant dense<0.000000e+00> : vector<8x256xf32>
    %62 = tpu.matmul %60, %61, %cst_34 {dimension_numbers = #tpu.dot_dimension_numbers<[1], [0], [0], [1], [0, 0, 1, 1], [], []>} : vector<8x256xf32>, vector<256x256xf32>, vector<8x256xf32> -> vector<8x256xf32>
    %c0_35 = arith.constant 0 : index
    %c0_36 = arith.constant 0 : index
    %63 = vector.load %arg3[%c0_35, %c0_36] : memref<1x256xf32, #tpu.memory_space<vmem>>, vector<1x256xf32>
    %64 = vector.broadcast %63 : vector<1x256xf32> to vector<8x256xf32>
    %65 = arith.addf %62, %64 : vector<8x256xf32>
    %c7_i32_37 = arith.constant 7 : i32
    %66 = arith.minsi %c2_i32, %c7_i32_37 : i32
    %c8_i32_38 = arith.constant 8 : i32
    %67 = arith.muli %66, %c8_i32_38 : i32
    %68 = tpu.assume_multiple %67, 8 : i32
    %69 = arith.index_cast %68 : i32 to index
    %c0_39 = arith.constant 0 : index
    %70 = vector.load %arg7[%69, %c0_39] : memref<64x128xf32, #tpu.memory_space<vmem>>, vector<8x128xf32>
    %71 = vector.extract_strided_slice %65 {offsets = [0, 0], sizes = [8, 128], strides = [1, 1]} : vector<8x256xf32> to vector<8x128xf32>
    %72 = arith.addf %71, %70 : vector<8x128xf32>
    %c0_i32_40 = arith.constant 0 : i32
    %73 = arith.subi %c2_i32, %c0_i32_40 : i32
    %c0_i32_41 = arith.constant 0 : i32
    %74 = arith.cmpi sge, %73, %c0_i32_41 : i32
    %c8_i32_42 = arith.constant 8 : i32
    %75 = arith.cmpi slt, %73, %c8_i32_42 : i32
    %76 = arith.andi %74, %75 : i1
    %77 = math.tanh %72 : vector<8x128xf32>
    %78 = vector.extract_strided_slice %60 {offsets = [0, 0], sizes = [8, 128], strides = [1, 1]} : vector<8x256xf32> to vector<8x128xf32>
    %79 = arith.select %76, %77, %78 : vector<8x128xf32>
    %80 = vector.extract_strided_slice %65 {offsets = [0, 128], sizes = [8, 128], strides = [1, 1]} : vector<8x256xf32> to vector<8x128xf32>
    %c1_i32_43 = arith.constant 1 : i32
    %81 = arith.subi %c2_i32, %c1_i32_43 : i32
    %c0_i32_44 = arith.constant 0 : i32
    %82 = arith.cmpi sge, %81, %c0_i32_44 : i32
    %c8_i32_45 = arith.constant 8 : i32
    %83 = arith.cmpi slt, %81, %c8_i32_45 : i32
    %84 = arith.andi %82, %83 : i1
    %85 = math.tanh %80 : vector<8x128xf32>
    %86 = vector.extract_strided_slice %60 {offsets = [0, 128], sizes = [8, 128], strides = [1, 1]} : vector<8x256xf32> to vector<8x128xf32>
    %87 = arith.select %84, %85, %86 : vector<8x128xf32>
    %88 = tpu.concatenate %79, %87 in 1 : vector<8x128xf32>, vector<8x128xf32> -> vector<8x256xf32>
    %c3_i32 = arith.constant 3 : i32
    %c0_46 = arith.constant 0 : index
    %c0_47 = arith.constant 0 : index
    %89 = vector.load %arg2[%c0_46, %c0_47] : memref<256x256xf32, #tpu.memory_space<vmem>>, vector<256x256xf32>
    %cst_48 = arith.constant dense<0.000000e+00> : vector<8x256xf32>
    %90 = tpu.matmul %88, %89, %cst_48 {dimension_numbers = #tpu.dot_dimension_numbers<[1], [0], [0], [1], [0, 0, 1, 1], [], []>} : vector<8x256xf32>, vector<256x256xf32>, vector<8x256xf32> -> vector<8x256xf32>
    %c0_49 = arith.constant 0 : index
    %c0_50 = arith.constant 0 : index
    %91 = vector.load %arg3[%c0_49, %c0_50] : memref<1x256xf32, #tpu.memory_space<vmem>>, vector<1x256xf32>
    %92 = vector.broadcast %91 : vector<1x256xf32> to vector<8x256xf32>
    %93 = arith.addf %90, %92 : vector<8x256xf32>
    %c7_i32_51 = arith.constant 7 : i32
    %94 = arith.minsi %c3_i32, %c7_i32_51 : i32
    %c8_i32_52 = arith.constant 8 : i32
    %95 = arith.muli %94, %c8_i32_52 : i32
    %96 = tpu.assume_multiple %95, 8 : i32
    %97 = arith.index_cast %96 : i32 to index
    %c0_53 = arith.constant 0 : index
    %98 = vector.load %arg7[%97, %c0_53] : memref<64x128xf32, #tpu.memory_space<vmem>>, vector<8x128xf32>
    %99 = vector.extract_strided_slice %93 {offsets = [0, 0], sizes = [8, 128], strides = [1, 1]} : vector<8x256xf32> to vector<8x128xf32>
    %100 = arith.addf %99, %98 : vector<8x128xf32>
    %c0_i32_54 = arith.constant 0 : i32
    %101 = arith.subi %c3_i32, %c0_i32_54 : i32
    %c0_i32_55 = arith.constant 0 : i32
    %102 = arith.cmpi sge, %101, %c0_i32_55 : i32
    %c8_i32_56 = arith.constant 8 : i32
    %103 = arith.cmpi slt, %101, %c8_i32_56 : i32
    %104 = arith.andi %102, %103 : i1
    %105 = math.tanh %100 : vector<8x128xf32>
    %106 = vector.extract_strided_slice %88 {offsets = [0, 0], sizes = [8, 128], strides = [1, 1]} : vector<8x256xf32> to vector<8x128xf32>
    %107 = arith.select %104, %105, %106 : vector<8x128xf32>
    %108 = vector.extract_strided_slice %93 {offsets = [0, 128], sizes = [8, 128], strides = [1, 1]} : vector<8x256xf32> to vector<8x128xf32>
    %c1_i32_57 = arith.constant 1 : i32
    %109 = arith.subi %c3_i32, %c1_i32_57 : i32
    %c0_i32_58 = arith.constant 0 : i32
    %110 = arith.cmpi sge, %109, %c0_i32_58 : i32
    %c8_i32_59 = arith.constant 8 : i32
    %111 = arith.cmpi slt, %109, %c8_i32_59 : i32
    %112 = arith.andi %110, %111 : i1
    %113 = math.tanh %108 : vector<8x128xf32>
    %114 = vector.extract_strided_slice %88 {offsets = [0, 128], sizes = [8, 128], strides = [1, 1]} : vector<8x256xf32> to vector<8x128xf32>
    %115 = arith.select %112, %113, %114 : vector<8x128xf32>
    %116 = tpu.concatenate %107, %115 in 1 : vector<8x128xf32>, vector<8x128xf32> -> vector<8x256xf32>
    %c4_i32 = arith.constant 4 : i32
    %c0_60 = arith.constant 0 : index
    %c0_61 = arith.constant 0 : index
    %117 = vector.load %arg2[%c0_60, %c0_61] : memref<256x256xf32, #tpu.memory_space<vmem>>, vector<256x256xf32>
    %cst_62 = arith.constant dense<0.000000e+00> : vector<8x256xf32>
    %118 = tpu.matmul %116, %117, %cst_62 {dimension_numbers = #tpu.dot_dimension_numbers<[1], [0], [0], [1], [0, 0, 1, 1], [], []>} : vector<8x256xf32>, vector<256x256xf32>, vector<8x256xf32> -> vector<8x256xf32>
    %c0_63 = arith.constant 0 : index
    %c0_64 = arith.constant 0 : index
    %119 = vector.load %arg3[%c0_63, %c0_64] : memref<1x256xf32, #tpu.memory_space<vmem>>, vector<1x256xf32>
    %120 = vector.broadcast %119 : vector<1x256xf32> to vector<8x256xf32>
    %121 = arith.addf %118, %120 : vector<8x256xf32>
    %c7_i32_65 = arith.constant 7 : i32
    %122 = arith.minsi %c4_i32, %c7_i32_65 : i32
    %c8_i32_66 = arith.constant 8 : i32
    %123 = arith.muli %122, %c8_i32_66 : i32
    %124 = tpu.assume_multiple %123, 8 : i32
    %125 = arith.index_cast %124 : i32 to index
    %c0_67 = arith.constant 0 : index
    %126 = vector.load %arg7[%125, %c0_67] : memref<64x128xf32, #tpu.memory_space<vmem>>, vector<8x128xf32>
    %127 = vector.extract_strided_slice %121 {offsets = [0, 0], sizes = [8, 128], strides = [1, 1]} : vector<8x256xf32> to vector<8x128xf32>
    %128 = arith.addf %127, %126 : vector<8x128xf32>
    %c0_i32_68 = arith.constant 0 : i32
    %129 = arith.subi %c4_i32, %c0_i32_68 : i32
    %c0_i32_69 = arith.constant 0 : i32
    %130 = arith.cmpi sge, %129, %c0_i32_69 : i32
    %c8_i32_70 = arith.constant 8 : i32
    %131 = arith.cmpi slt, %129, %c8_i32_70 : i32
    %132 = arith.andi %130, %131 : i1
    %133 = math.tanh %128 : vector<8x128xf32>
    %134 = vector.extract_strided_slice %116 {offsets = [0, 0], sizes = [8, 128], strides = [1, 1]} : vector<8x256xf32> to vector<8x128xf32>
    %135 = arith.select %132, %133, %134 : vector<8x128xf32>
    %136 = vector.extract_strided_slice %121 {offsets = [0, 128], sizes = [8, 128], strides = [1, 1]} : vector<8x256xf32> to vector<8x128xf32>
    %c1_i32_71 = arith.constant 1 : i32
    %137 = arith.subi %c4_i32, %c1_i32_71 : i32
    %c0_i32_72 = arith.constant 0 : i32
    %138 = arith.cmpi sge, %137, %c0_i32_72 : i32
    %c8_i32_73 = arith.constant 8 : i32
    %139 = arith.cmpi slt, %137, %c8_i32_73 : i32
    %140 = arith.andi %138, %139 : i1
    %141 = math.tanh %136 : vector<8x128xf32>
    %142 = vector.extract_strided_slice %116 {offsets = [0, 128], sizes = [8, 128], strides = [1, 1]} : vector<8x256xf32> to vector<8x128xf32>
    %143 = arith.select %140, %141, %142 : vector<8x128xf32>
    %144 = tpu.concatenate %135, %143 in 1 : vector<8x128xf32>, vector<8x128xf32> -> vector<8x256xf32>
    %c5_i32 = arith.constant 5 : i32
    %c0_74 = arith.constant 0 : index
    %c0_75 = arith.constant 0 : index
    %145 = vector.load %arg2[%c0_74, %c0_75] : memref<256x256xf32, #tpu.memory_space<vmem>>, vector<256x256xf32>
    %cst_76 = arith.constant dense<0.000000e+00> : vector<8x256xf32>
    %146 = tpu.matmul %144, %145, %cst_76 {dimension_numbers = #tpu.dot_dimension_numbers<[1], [0], [0], [1], [0, 0, 1, 1], [], []>} : vector<8x256xf32>, vector<256x256xf32>, vector<8x256xf32> -> vector<8x256xf32>
    %c0_77 = arith.constant 0 : index
    %c0_78 = arith.constant 0 : index
    %147 = vector.load %arg3[%c0_77, %c0_78] : memref<1x256xf32, #tpu.memory_space<vmem>>, vector<1x256xf32>
    %148 = vector.broadcast %147 : vector<1x256xf32> to vector<8x256xf32>
    %149 = arith.addf %146, %148 : vector<8x256xf32>
    %c7_i32_79 = arith.constant 7 : i32
    %150 = arith.minsi %c5_i32, %c7_i32_79 : i32
    %c8_i32_80 = arith.constant 8 : i32
    %151 = arith.muli %150, %c8_i32_80 : i32
    %152 = tpu.assume_multiple %151, 8 : i32
    %153 = arith.index_cast %152 : i32 to index
    %c0_81 = arith.constant 0 : index
    %154 = vector.load %arg7[%153, %c0_81] : memref<64x128xf32, #tpu.memory_space<vmem>>, vector<8x128xf32>
    %155 = vector.extract_strided_slice %149 {offsets = [0, 0], sizes = [8, 128], strides = [1, 1]} : vector<8x256xf32> to vector<8x128xf32>
    %156 = arith.addf %155, %154 : vector<8x128xf32>
    %c0_i32_82 = arith.constant 0 : i32
    %157 = arith.subi %c5_i32, %c0_i32_82 : i32
    %c0_i32_83 = arith.constant 0 : i32
    %158 = arith.cmpi sge, %157, %c0_i32_83 : i32
    %c8_i32_84 = arith.constant 8 : i32
    %159 = arith.cmpi slt, %157, %c8_i32_84 : i32
    %160 = arith.andi %158, %159 : i1
    %161 = math.tanh %156 : vector<8x128xf32>
    %162 = vector.extract_strided_slice %144 {offsets = [0, 0], sizes = [8, 128], strides = [1, 1]} : vector<8x256xf32> to vector<8x128xf32>
    %163 = arith.select %160, %161, %162 : vector<8x128xf32>
    %164 = vector.extract_strided_slice %149 {offsets = [0, 128], sizes = [8, 128], strides = [1, 1]} : vector<8x256xf32> to vector<8x128xf32>
    %c1_i32_85 = arith.constant 1 : i32
    %165 = arith.subi %c5_i32, %c1_i32_85 : i32
    %c0_i32_86 = arith.constant 0 : i32
    %166 = arith.cmpi sge, %165, %c0_i32_86 : i32
    %c8_i32_87 = arith.constant 8 : i32
    %167 = arith.cmpi slt, %165, %c8_i32_87 : i32
    %168 = arith.andi %166, %167 : i1
    %169 = math.tanh %164 : vector<8x128xf32>
    %170 = vector.extract_strided_slice %144 {offsets = [0, 128], sizes = [8, 128], strides = [1, 1]} : vector<8x256xf32> to vector<8x128xf32>
    %171 = arith.select %168, %169, %170 : vector<8x128xf32>
    %172 = tpu.concatenate %163, %171 in 1 : vector<8x128xf32>, vector<8x128xf32> -> vector<8x256xf32>
    %c6_i32 = arith.constant 6 : i32
    %c0_88 = arith.constant 0 : index
    %c0_89 = arith.constant 0 : index
    %173 = vector.load %arg2[%c0_88, %c0_89] : memref<256x256xf32, #tpu.memory_space<vmem>>, vector<256x256xf32>
    %cst_90 = arith.constant dense<0.000000e+00> : vector<8x256xf32>
    %174 = tpu.matmul %172, %173, %cst_90 {dimension_numbers = #tpu.dot_dimension_numbers<[1], [0], [0], [1], [0, 0, 1, 1], [], []>} : vector<8x256xf32>, vector<256x256xf32>, vector<8x256xf32> -> vector<8x256xf32>
    %c0_91 = arith.constant 0 : index
    %c0_92 = arith.constant 0 : index
    %175 = vector.load %arg3[%c0_91, %c0_92] : memref<1x256xf32, #tpu.memory_space<vmem>>, vector<1x256xf32>
    %176 = vector.broadcast %175 : vector<1x256xf32> to vector<8x256xf32>
    %177 = arith.addf %174, %176 : vector<8x256xf32>
    %c7_i32_93 = arith.constant 7 : i32
    %178 = arith.minsi %c6_i32, %c7_i32_93 : i32
    %c8_i32_94 = arith.constant 8 : i32
    %179 = arith.muli %178, %c8_i32_94 : i32
    %180 = tpu.assume_multiple %179, 8 : i32
    %181 = arith.index_cast %180 : i32 to index
    %c0_95 = arith.constant 0 : index
    %182 = vector.load %arg7[%181, %c0_95] : memref<64x128xf32, #tpu.memory_space<vmem>>, vector<8x128xf32>
    %183 = vector.extract_strided_slice %177 {offsets = [0, 0], sizes = [8, 128], strides = [1, 1]} : vector<8x256xf32> to vector<8x128xf32>
    %184 = arith.addf %183, %182 : vector<8x128xf32>
    %c0_i32_96 = arith.constant 0 : i32
    %185 = arith.subi %c6_i32, %c0_i32_96 : i32
    %c0_i32_97 = arith.constant 0 : i32
    %186 = arith.cmpi sge, %185, %c0_i32_97 : i32
    %c8_i32_98 = arith.constant 8 : i32
    %187 = arith.cmpi slt, %185, %c8_i32_98 : i32
    %188 = arith.andi %186, %187 : i1
    %189 = math.tanh %184 : vector<8x128xf32>
    %190 = vector.extract_strided_slice %172 {offsets = [0, 0], sizes = [8, 128], strides = [1, 1]} : vector<8x256xf32> to vector<8x128xf32>
    %191 = arith.select %188, %189, %190 : vector<8x128xf32>
    %192 = vector.extract_strided_slice %177 {offsets = [0, 128], sizes = [8, 128], strides = [1, 1]} : vector<8x256xf32> to vector<8x128xf32>
    %c1_i32_99 = arith.constant 1 : i32
    %193 = arith.subi %c6_i32, %c1_i32_99 : i32
    %c0_i32_100 = arith.constant 0 : i32
    %194 = arith.cmpi sge, %193, %c0_i32_100 : i32
    %c8_i32_101 = arith.constant 8 : i32
    %195 = arith.cmpi slt, %193, %c8_i32_101 : i32
    %196 = arith.andi %194, %195 : i1
    %197 = math.tanh %192 : vector<8x128xf32>
    %198 = vector.extract_strided_slice %172 {offsets = [0, 128], sizes = [8, 128], strides = [1, 1]} : vector<8x256xf32> to vector<8x128xf32>
    %199 = arith.select %196, %197, %198 : vector<8x128xf32>
    %200 = tpu.concatenate %191, %199 in 1 : vector<8x128xf32>, vector<8x128xf32> -> vector<8x256xf32>
    %c7_i32_102 = arith.constant 7 : i32
    %c0_103 = arith.constant 0 : index
    %c0_104 = arith.constant 0 : index
    %201 = vector.load %arg2[%c0_103, %c0_104] : memref<256x256xf32, #tpu.memory_space<vmem>>, vector<256x256xf32>
    %cst_105 = arith.constant dense<0.000000e+00> : vector<8x256xf32>
    %202 = tpu.matmul %200, %201, %cst_105 {dimension_numbers = #tpu.dot_dimension_numbers<[1], [0], [0], [1], [0, 0, 1, 1], [], []>} : vector<8x256xf32>, vector<256x256xf32>, vector<8x256xf32> -> vector<8x256xf32>
    %c0_106 = arith.constant 0 : index
    %c0_107 = arith.constant 0 : index
    %203 = vector.load %arg3[%c0_106, %c0_107] : memref<1x256xf32, #tpu.memory_space<vmem>>, vector<1x256xf32>
    %204 = vector.broadcast %203 : vector<1x256xf32> to vector<8x256xf32>
    %205 = arith.addf %202, %204 : vector<8x256xf32>
    %c7_i32_108 = arith.constant 7 : i32
    %206 = arith.minsi %c7_i32_102, %c7_i32_108 : i32
    %c8_i32_109 = arith.constant 8 : i32
    %207 = arith.muli %206, %c8_i32_109 : i32
    %208 = tpu.assume_multiple %207, 8 : i32
    %209 = arith.index_cast %208 : i32 to index
    %c0_110 = arith.constant 0 : index
    %210 = vector.load %arg7[%209, %c0_110] : memref<64x128xf32, #tpu.memory_space<vmem>>, vector<8x128xf32>
    %211 = vector.extract_strided_slice %205 {offsets = [0, 0], sizes = [8, 128], strides = [1, 1]} : vector<8x256xf32> to vector<8x128xf32>
    %212 = arith.addf %211, %210 : vector<8x128xf32>
    %c0_i32_111 = arith.constant 0 : i32
    %213 = arith.subi %c7_i32_102, %c0_i32_111 : i32
    %c0_i32_112 = arith.constant 0 : i32
    %214 = arith.cmpi sge, %213, %c0_i32_112 : i32
    %c8_i32_113 = arith.constant 8 : i32
    %215 = arith.cmpi slt, %213, %c8_i32_113 : i32
    %216 = arith.andi %214, %215 : i1
    %217 = math.tanh %212 : vector<8x128xf32>
    %218 = vector.extract_strided_slice %200 {offsets = [0, 0], sizes = [8, 128], strides = [1, 1]} : vector<8x256xf32> to vector<8x128xf32>
    %219 = arith.select %216, %217, %218 : vector<8x128xf32>
    %220 = vector.extract_strided_slice %205 {offsets = [0, 128], sizes = [8, 128], strides = [1, 1]} : vector<8x256xf32> to vector<8x128xf32>
    %c1_i32_114 = arith.constant 1 : i32
    %221 = arith.subi %c7_i32_102, %c1_i32_114 : i32
    %c0_i32_115 = arith.constant 0 : i32
    %222 = arith.cmpi sge, %221, %c0_i32_115 : i32
    %c8_i32_116 = arith.constant 8 : i32
    %223 = arith.cmpi slt, %221, %c8_i32_116 : i32
    %224 = arith.andi %222, %223 : i1
    %225 = math.tanh %220 : vector<8x128xf32>
    %226 = vector.extract_strided_slice %200 {offsets = [0, 128], sizes = [8, 128], strides = [1, 1]} : vector<8x256xf32> to vector<8x128xf32>
    %227 = arith.select %224, %225, %226 : vector<8x128xf32>
    %228 = tpu.concatenate %219, %227 in 1 : vector<8x128xf32>, vector<8x128xf32> -> vector<8x256xf32>
    %c8_i32_117 = arith.constant 8 : i32
    %c0_118 = arith.constant 0 : index
    %c0_119 = arith.constant 0 : index
    %229 = vector.load %arg2[%c0_118, %c0_119] : memref<256x256xf32, #tpu.memory_space<vmem>>, vector<256x256xf32>
    %cst_120 = arith.constant dense<0.000000e+00> : vector<8x256xf32>
    %230 = tpu.matmul %228, %229, %cst_120 {dimension_numbers = #tpu.dot_dimension_numbers<[1], [0], [0], [1], [0, 0, 1, 1], [], []>} : vector<8x256xf32>, vector<256x256xf32>, vector<8x256xf32> -> vector<8x256xf32>
    %c0_121 = arith.constant 0 : index
    %c0_122 = arith.constant 0 : index
    %231 = vector.load %arg3[%c0_121, %c0_122] : memref<1x256xf32, #tpu.memory_space<vmem>>, vector<1x256xf32>
    %232 = vector.broadcast %231 : vector<1x256xf32> to vector<8x256xf32>
    %233 = arith.addf %230, %232 : vector<8x256xf32>
    %c7_i32_123 = arith.constant 7 : i32
    %234 = arith.minsi %c8_i32_117, %c7_i32_123 : i32
    %c8_i32_124 = arith.constant 8 : i32
    %235 = arith.muli %234, %c8_i32_124 : i32
    %236 = tpu.assume_multiple %235, 8 : i32
    %237 = arith.index_cast %236 : i32 to index
    %c0_125 = arith.constant 0 : index
    %238 = vector.load %arg7[%237, %c0_125] : memref<64x128xf32, #tpu.memory_space<vmem>>, vector<8x128xf32>
    %239 = vector.extract_strided_slice %233 {offsets = [0, 0], sizes = [8, 128], strides = [1, 1]} : vector<8x256xf32> to vector<8x128xf32>
    %240 = arith.addf %239, %238 : vector<8x128xf32>
    %c0_i32_126 = arith.constant 0 : i32
    %241 = arith.subi %c8_i32_117, %c0_i32_126 : i32
    %c0_i32_127 = arith.constant 0 : i32
    %242 = arith.cmpi sge, %241, %c0_i32_127 : i32
    %c8_i32_128 = arith.constant 8 : i32
    %243 = arith.cmpi slt, %241, %c8_i32_128 : i32
    %244 = arith.andi %242, %243 : i1
    %245 = math.tanh %240 : vector<8x128xf32>
    %246 = vector.extract_strided_slice %228 {offsets = [0, 0], sizes = [8, 128], strides = [1, 1]} : vector<8x256xf32> to vector<8x128xf32>
    %247 = arith.select %244, %245, %246 : vector<8x128xf32>
    %248 = vector.extract_strided_slice %233 {offsets = [0, 128], sizes = [8, 128], strides = [1, 1]} : vector<8x256xf32> to vector<8x128xf32>
    %c1_i32_129 = arith.constant 1 : i32
    %249 = arith.subi %c8_i32_117, %c1_i32_129 : i32
    %c0_i32_130 = arith.constant 0 : i32
    %250 = arith.cmpi sge, %249, %c0_i32_130 : i32
    %c8_i32_131 = arith.constant 8 : i32
    %251 = arith.cmpi slt, %249, %c8_i32_131 : i32
    %252 = arith.andi %250, %251 : i1
    %253 = math.tanh %248 : vector<8x128xf32>
    %254 = vector.extract_strided_slice %228 {offsets = [0, 128], sizes = [8, 128], strides = [1, 1]} : vector<8x256xf32> to vector<8x128xf32>
    %255 = arith.select %252, %253, %254 : vector<8x128xf32>
    %256 = tpu.concatenate %247, %255 in 1 : vector<8x128xf32>, vector<8x128xf32> -> vector<8x256xf32>
    %c9_i32 = arith.constant 9 : i32
    %257 = vector.extract_strided_slice %256 {offsets = [0, 128], sizes = [8, 128], strides = [1, 1]} : vector<8x256xf32> to vector<8x128xf32>
    %c0_132 = arith.constant 0 : index
    %c0_133 = arith.constant 0 : index
    %258 = vector.load %arg4[%c0_132, %c0_133] : memref<128x128xf32, #tpu.memory_space<vmem>>, vector<128x128xf32>
    %cst_134 = arith.constant dense<0.000000e+00> : vector<8x128xf32>
    %259 = tpu.matmul %257, %258, %cst_134 {dimension_numbers = #tpu.dot_dimension_numbers<[1], [0], [0], [1], [0, 0, 1, 1], [], []>} : vector<8x128xf32>, vector<128x128xf32>, vector<8x128xf32> -> vector<8x128xf32>
    %c0_135 = arith.constant 0 : index
    %c0_136 = arith.constant 0 : index
    %260 = vector.load %arg5[%c0_135, %c0_136] : memref<1x128xf32, #tpu.memory_space<vmem>>, vector<1x128xf32>
    %261 = vector.broadcast %260 : vector<1x128xf32> to vector<8x128xf32>
    %262 = arith.addf %259, %261 : vector<8x128xf32>
    %c0_137 = arith.constant 0 : index
    %c0_138 = arith.constant 0 : index
    %263 = vector.load %arg6[%c0_137, %c0_138] : memref<8x128xf32, #tpu.memory_space<vmem>>, vector<8x128xf32>
    tpu.vector_store %arg6[%c0_137, %c0_138], %262 {strides = array<i32>} : memref<8x128xf32, #tpu.memory_space<vmem>>, vector<8x128xf32>,
    return
  }
}

</mosaic_0001>

<bundles_post_ra>
// kernel: rnn_model_forward.1
= control target key start
LH: loop header
LB: loop body
LE: loop exit
PB: predicated region body
PF: predicated region fallthrough
CT: control target
= control target key end

     0   :  { %v1798_v3 = vmov 0.0   ;;  %vm1800_vm0 = vmmov 0   ;;  %s2548_s2 = inlined_call_operand.vmem [shape: f32[256,256], index: 2, kind: input, shape index: {}]   ;;  %s2549_s1 = inlined_call_operand.vmem [shape: f32[128,128], index: 1, kind: input, shape index: {}]   ;;  %s2550_s0 = inlined_call_operand.vmem [shape: f32[64,128], index: 0, kind: input, shape index: {}]   ;;  %s2551_s3 = inlined_call_operand.vmem [shape: f32[1,256], index: 3, kind: input, shape index: {}]   ;;  %s2552_s4 = inlined_call_operand.vmem [shape: f32[128,128], index: 4, kind: input, shape index: {}]   ;;  %s2553_s5 = inlined_call_operand.vmem [shape: f32[1,128], index: 5, kind: input, shape index: {}]   ;;  %s2554_s6 = inlined_call_operand.vmem [shape: f32[8,128], index: 6, kind: output, shape index: {}]  }
   0x1   :  { %v161_v0 = vld [vmem:[%s2548_s2 + $0x8] sm:$0xff]  ;;  %v163_v1 = vld [vmem:[%s2548_s2 + $0x18] sm:$0xff]  ;;  %v160_v2 = vld [vmem:[%s2548_s2] sm:$0xff]  ;;  %300 = vmatprep.mubr.f32.mxu1 %v1798_v3 }
   0x2   :  { %v1846_v4 = vpack.c.bf16 %v163_v1, %v161_v0  ;;  %v162_v5 = vld [vmem:[%s2548_s2 + $0x10] sm:$0xff]  ;;  %v165_v6 = vld [vmem:[%s2548_s2 + $0x28] sm:$0xff]  ;;  %v167_v7 = vld [vmem:[%s2548_s2 + $0x38] sm:$0xff] }
   0x3   :  { %v1857_v8 = vpack.c.bf16 %v162_v5, %v160_v2  ;;  %v1859_v9 = vpack.c.bf16 %v167_v7, %v165_v6  ;;  %v164_v10 = vld [vmem:[%s2548_s2 + $0x20] sm:$0xff]  ;;  %v166_v11 = vld [vmem:[%s2548_s2 + $0x30] sm:$0xff]  ;;  %v169_v12 = vld [vmem:[%s2548_s2 + $0x48] sm:$0xff] }
   0x4   :  { %1164 = vmatprep.subr.bf16.mxu1 %v1846_v4  ;;  %v171_v13 = vld [vmem:[%s2548_s2 + $0x58] sm:$0xff]  ;;  %v1875_v14 = vpack.c.bf16 %v166_v11, %v164_v10  ;;  %v168_v16 = vld [vmem:[%s2548_s2 + $0x40] sm:$0xff]  ;;  %v170_v17 = vld [vmem:[%s2548_s2 + $0x50] sm:$0xff] }
   0x5   :  { %1166 = vmatpush1.bf16.msra.mxu1 %v1857_v8  ;;  %v1878_v15 = vpack.c.bf16 %v171_v13, %v169_v12  ;;  %v173_v18 = vld [vmem:[%s2548_s2 + $0x68] sm:$0xff]  ;;  %v175_v19 = vld [vmem:[%s2548_s2 + $0x78] sm:$0xff]  ;;  %v1893_v20 = vpack.c.bf16 %v170_v17, %v168_v16  ;;  %v172_v22 = vld [vmem:[%s2548_s2 + $0x60] sm:$0xff] }
   0x6   :  { %1168 = vmatprep.subr.bf16.mxu1 %v1859_v9  ;;  %v1896_v21 = vpack.c.bf16 %v175_v19, %v173_v18  ;;  %v174_v23 = vld [vmem:[%s2548_s2 + $0x70] sm:$0xff]  ;;  %v177_v24 = vld [vmem:[%s2548_s2 + $0x88] sm:$0xff]  ;;  %v179_v25 = vld [vmem:[%s2548_s2 + $0x98] sm:$0xff] }
   0x7   :  { %v31_v26 = vld [vmem:[%s2549_s1] sm:$0xff]  ;;  %v32_v27 = vld [vmem:[%s2549_s1 + $0x8] sm:$0xff]  ;;  %v1917_v28 = vpack.c.bf16 %v174_v23, %v172_v22  ;;  %v33_v30 = vld [vmem:[%s2549_s1 + $0x10] sm:$0xff]  ;;  %v1923_v31 = vpack.c.bf16 %v179_v25, %v177_v24 }
   0x8   :  { %v1131_v29 = vpack.c.bf16 %v32_v27, %v31_v26  ;;  %v176_v32 = vld [vmem:[%s2548_s2 + $0x80] sm:$0xff]  ;;  %v178_v33 = vld [vmem:[%s2548_s2 + $0x90] sm:$0xff]  ;;  %v34_v34 = vld [vmem:[%s2549_s1 + $0x18] sm:$0xff] }
   0x9   :  { %1170 = vmatpush1.bf16.msra.mxu1 %v1875_v14  ;;  %v181_v35 = vld [vmem:[%s2548_s2 + $0xa8] sm:$0xff]  ;;  %v183_v36 = vld [vmem:[%s2548_s2 + $0xb8] sm:$0xff]  ;;  %v1135_v37 = vpack.c.bf16 %v34_v34, %v33_v30  ;;  %v35_v38 = vld [vmem:[%s2549_s1 + $0x20] sm:$0xff]  ;;  %v1947_v40 = vpack.c.bf16 %v178_v33, %v176_v32 }
   0xa   :  { %1172 = vmatprep.subr.bf16.mxu1 %v1878_v15  ;;  %1132 = vmatprep.subr.bf16.mxu0 %v1131_v29  ;;  %v36_v39 = vld [vmem:[%s2549_s1 + $0x28] sm:$0xff]  ;;  %v180_v41 = vld [vmem:[%s2548_s2 + $0xa0] sm:$0xff]  ;;  %v1953_v43 = vpack.c.bf16 %v183_v36, %v181_v35  ;;  %v182_v44 = vld [vmem:[%s2548_s2 + $0xb0] sm:$0xff] }
   0xb   :  { %1134 = vmatpush3.bf16.msra.mxu0 %v1131_v29  ;;  %v1139_v42 = vpack.c.bf16 %v36_v39, %v35_v38  ;;  %v37_v45 = vld [vmem:[%s2549_s1 + $0x30] sm:$0xff]  ;;  %v38_v46 = vld [vmem:[%s2549_s1 + $0x38] sm:$0xff]  ;;  %v185_v47 = vld [vmem:[%s2548_s2 + $0xc8] sm:$0xff]  ;;  %v1971_v49 = vpack.c.bf16 %v182_v44, %v180_v41 }
   0xc   :  { %1136 = vmatprep.subr.bf16.mxu0 %v1135_v37  ;;  %v187_v48 = vld [vmem:[%s2548_s2 + $0xd8] sm:$0xff]  ;;  %v184_v50 = vld [vmem:[%s2548_s2 + $0xc0] sm:$0xff]  ;;  %v1143_v51 = vpack.c.bf16 %v38_v46, %v37_v45  ;;  %v186_v53 = vld [vmem:[%s2548_s2 + $0xd0] sm:$0xff] }
   0xd   :  { %1174 = vmatpush1.bf16.msra.mxu1 %v1893_v20  ;;  %v1977_v52 = vpack.c.bf16 %v187_v48, %v185_v47  ;;  %v39_v54 = vld [vmem:[%s2549_s1 + $0x40] sm:$0xff]  ;;  %v40_v55 = vld [vmem:[%s2549_s1 + $0x48] sm:$0xff]  ;;  %v191_v57 = vld [vmem:[%s2548_s2 + $0xf8] sm:$0xff]  ;;  %v1995_v58 = vpack.c.bf16 %v186_v53, %v184_v50 }
   0xe   :  { %1176 = vmatprep.subr.bf16.mxu1 %v1896_v21  ;;  %v189_v56 = vld [vmem:[%s2548_s2 + $0xe8] sm:$0xff]  ;;  %v188_v59 = vld [vmem:[%s2548_s2 + $0xe0] sm:$0xff]  ;;  %v1147_v60 = vpack.c.bf16 %v40_v55, %v39_v54  ;;  %v190_v62 = vld [vmem:[%s2548_s2 + $0xf0] sm:$0xff] }
   0xf   :  { %1138 = vmatpush3.bf16.msra.mxu0 %v1135_v37  ;;  %v2001_v61 = vpack.c.bf16 %v191_v57, %v189_v56  ;;  %v41_v63 = vld [vmem:[%s2549_s1 + $0x50] sm:$0xff]  ;;  %v42_v0 = vld [vmem:[%s2549_s1 + $0x58] sm:$0xff]  ;;  %v193_v1 = vld [vmem:[%s2548_s2 + $0x108] sm:$0xff]  ;;  %v2022_v6 = vpack.c.bf16 %v190_v62, %v188_v59 }
  0x10   :  { %1140 = vmatprep.subr.bf16.mxu0 %v1139_v42  ;;  %v195_v2 = vld [vmem:[%s2548_s2 + $0x118] sm:$0xff]  ;;  %v23_v5 = vld [vmem:[%s2550_s0] sm:$0xff]  ;;  %v1151_v10 = vpack.c.bf16 %v42_v0, %v41_v63  ;;  %v194_v12 = vld [vmem:[%s2548_s2 + $0x110] sm:$0xff] }
  0x11   :  { %1178 = vmatpush1.bf16.msra.mxu1 %v1917_v28  ;;  %1084 = vmatprep.mubr.f32.mxu0 %v23_v5  ;;  %v192_v7 = vld [vmem:[%s2548_s2 + $0x100] sm:$0xff]  ;;  %v2028_v11 = vpack.c.bf16 %v195_v2, %v193_v1  ;;  %v44_v16 = vld [vmem:[%s2549_s1 + $0x68] sm:$0xff]  ;;  %v199_v18 = vld [vmem:[%s2548_s2 + $0x138] sm:$0xff] }
  0x12   :  { %1180 = vmatprep.subr.bf16.mxu1 %v1923_v31  ;;  %v43_v13 = vld [vmem:[%s2549_s1 + $0x60] sm:$0xff]  ;;  %v197_v17 = vld [vmem:[%s2548_s2 + $0x128] sm:$0xff]  ;;  %v2046_v19 = vpack.c.bf16 %v194_v12, %v192_v7  ;;  %v198_v25 = vld [vmem:[%s2548_s2 + $0x130] sm:$0xff] }
  0x13   :  { %1142 = vmatpush3.bf16.msra.mxu0 %v1139_v42  ;;  %v196_v22 = vld [vmem:[%s2548_s2 + $0x120] sm:$0xff]  ;;  %v1155_v23 = vpack.c.bf16 %v44_v16, %v43_v13  ;;  %v2052_v24 = vpack.c.bf16 %v199_v18, %v197_v17  ;;  %v45_v26 = vld [vmem:[%s2549_s1 + $0x70] sm:$0xff]  ;;  %v46_v27 = vld [vmem:[%s2549_s1 + $0x78] sm:$0xff] }
  0x14   :  { %1144 = vmatprep.subr.bf16.mxu0 %v1143_v51  ;;  %v201_v29 = vld [vmem:[%s2548_s2 + $0x148] sm:$0xff]  ;;  %v203_v30 = vld [vmem:[%s2548_s2 + $0x158] sm:$0xff]  ;;  %v2070_v32 = vpack.c.bf16 %v198_v25, %v196_v22  ;;  %v1159_v33 = vpack.c.bf16 %v46_v27, %v45_v26  ;;  %v200_v35 = vld [vmem:[%s2548_s2 + $0x140] sm:$0xff] }
  0x15   :  { %1182 = vmatpush1.bf16.msra.mxu1 %v1947_v40  ;;  %v2073_v34 = vpack.c.bf16 %v203_v30, %v201_v29  ;;  %v202_v36 = vld [vmem:[%s2548_s2 + $0x150] sm:$0xff]  ;;  %v205_v37 = vld [vmem:[%s2548_s2 + $0x168] sm:$0xff]  ;;  %v207_v38 = vld [vmem:[%s2548_s2 + $0x178] sm:$0xff] }
  0x16   :  { %1184 = vmatprep.subr.bf16.mxu1 %v1953_v43  ;;  %v2088_v39 = vpack.c.bf16 %v202_v36, %v200_v35  ;;  %v2091_v41 = vpack.c.bf16 %v207_v38, %v205_v37  ;;  %v204_v42 = vld [vmem:[%s2548_s2 + $0x160] sm:$0xff]  ;;  %v206_v44 = vld [vmem:[%s2548_s2 + $0x170] sm:$0xff]  ;;  %v209_v45 = vld [vmem:[%s2548_s2 + $0x188] sm:$0xff]  ;;  %v226_v35 = vlaneseq }
  0x17   :  { %1146 = vmatpush3.bf16.msra.mxu0 %v1143_v51  ;;  %v211_v46 = vld [vmem:[%s2548_s2 + $0x198] sm:$0xff]  ;;  %v24_v47 = vld [vmem:[%s2550_s0 + $0x8] sm:$0xff]  ;;  %v2109_v48 = vpack.c.bf16 %v206_v44, %v204_v42  ;;  %v208_v51 = vld [vmem:[%s2548_s2 + $0x180] sm:$0xff] }
  0x18   :  { %1148 = vmatprep.subr.bf16.mxu0 %v1147_v60  ;;  %v2113_v50 = vpack.c.bf16 %v211_v46, %v209_v45  ;;  %v210_v53 = vld [vmem:[%s2548_s2 + $0x190] sm:$0xff]  ;;  %v213_v54 = vld [vmem:[%s2548_s2 + $0x1a8] sm:$0xff]  ;;  %v215_v55 = vld [vmem:[%s2548_s2 + $0x1b8] sm:$0xff]  ;;  %v227_v36 = vshrl.u32 %v226_v35, 7 }
  0x19   :  { %1186 = vmatpush1.bf16.msra.mxu1 %v1971_v49  ;;  %v2129_v56 = vpack.c.bf16 %v210_v53, %v208_v51  ;;  %v2133_v57 = vpack.c.bf16 %v215_v55, %v213_v54  ;;  %v212_v59 = vld [vmem:[%s2548_s2 + $0x1a0] sm:$0xff]  ;;  %v217_v62 = vld [vmem:[%s2548_s2 + $0x1c8] sm:$0xff]  ;;  %v219_v63 = vld [vmem:[%s2548_s2 + $0x1d8] sm:$0xff] }
  0x1a   :  { %1188 = vmatprep.subr.bf16.mxu1 %v1977_v52  ;;  %v2153_v1 = vpack.c.bf16 %v219_v63, %v217_v62  ;;  %v216_v2 = vld [vmem:[%s2548_s2 + $0x1c0] sm:$0xff]  ;;  %v218_v5 = vld [vmem:[%s2548_s2 + $0x1d0] sm:$0xff]  ;;  %v221_v7 = vld [vmem:[%s2548_s2 + $0x1e8] sm:$0xff]  ;;  %v228_v37 = vsub.s32 0, %v227_v36  ;;  %v232_v63 = vsub.s32 1, %v227_v36 }
  0x1b   :  { %1150 = vmatpush3.bf16.msra.mxu0 %v1147_v60  ;;  %v214_v60 = vld [vmem:[%s2548_s2 + $0x1b0] sm:$0xff]  ;;  %v2169_v12 = vpack.c.bf16 %v218_v5, %v216_v2  ;;  %v220_v16 = vld [vmem:[%s2548_s2 + $0x1e0] sm:$0xff]  ;;  %v28_v26 = vld [vmem:[%s2550_s0 + $0x28] sm:$0xff] }
  0x1c   :  { %1152 = vmatprep.subr.bf16.mxu0 %v1151_v10  ;;  %v2149_v0 = vpack.c.bf16 %v214_v60, %v212_v59  ;;  %v222_v17 = vld [vmem:[%s2548_s2 + $0x1f0] sm:$0xff]  ;;  %v27_v25 = vld [vmem:[%s2550_s0 + $0x20] sm:$0xff]  ;;  %v30_v29 = vld [vmem:[%s2550_s0 + $0x38] sm:$0xff] }
  0x1d   :  { %1190 = vmatpush1.bf16.msra.mxu1 %v1995_v58  ;;  %v2183_v18 = vpack.c.bf16 %v222_v17, %v220_v16  ;;  %v25_v22 = vld [vmem:[%s2550_s0 + $0x10] sm:$0xff]  ;;  %v224_v38 = vld [vmem:[%s2551_s3] sm:$0x3] }
  0x1e   :  { %1192 = vmatprep.subr.bf16.mxu1 %v2001_v61  ;;  %v29_v27 = vld [vmem:[%s2550_s0 + $0x30] sm:$0xff]  ;;  %v2268_v42 = vrot.slane %v224_v38, %v228_v37  ;;  %v2313_v2 = vrot.slane %v224_v38, %v232_v63 }
  0x1f   :  { %1154 = vmatpush3.bf16.msra.mxu0 %v1151_v10  ;;  %v223_v10 = vld [vmem:[%s2548_s2 + $0x1f8] sm:$0xff] }
  0x20   :  { %1156 = vmatprep.subr.bf16.mxu0 %v1155_v23  ;;  %v2173_v13 = vpack.c.bf16 %v223_v10, %v221_v7 }
  0x21   :  { %1194 = vmatpush1.bf16.msra.mxu1 %v2022_v6 }
  0x22   :  { %1196 = vmatprep.subr.bf16.mxu1 %v2028_v11 }
  0x23   :  { %1158 = vmatpush3.bf16.msra.mxu0 %v1155_v23  ;;  %v26_v23 = vld [vmem:[%s2550_s0 + $0x18] sm:$0xff] }
  0x24   :  { %1160 = vmatprep.subr.bf16.mxu0 %v1159_v33 }
  0x25   :  { %1198 = vmatpush1.bf16.msra.mxu1 %v2046_v19 }
  0x26   :  { %1200 = vmatprep.subr.bf16.mxu1 %v2052_v24 }
  0x27   :  { %1162 = vmatpush3.bf16.msra.mxu0 %v1159_v33 }
  0x28   :  { %1228 = vmatprep.subr.bf16.mxu0 %v1846_v4 }
  0x29   :  { %1202 = vmatpush1.bf16.msra.mxu1 %v2070_v32 }
  0x2a   :  { %1204 = vmatprep.subr.bf16.mxu1 %v2073_v34  ;;  %1085 = vmatmul.mubr.f32.vlgmr.msra.gmra.mrb[0].mxu0 %v24_v47 }
  0x2b   :  { %1230 = vmatpush1.bf16.msra.mxu0 %v1857_v8  ;;  %1087 = vmatprep.mubr.f32.mxu0 %v25_v22 }
  0x2c   :  { %1232 = vmatprep.subr.bf16.mxu0 %v1859_v9 }
  0x2d   :  { %1206 = vmatpush1.bf16.msra.mxu1 %v2088_v39 }
  0x2e   :  { %1208 = vmatprep.subr.bf16.mxu1 %v2091_v41  ;;  %1088 = vmatmul.mubr.f32.gmra.mrb[2].mxu0 %v26_v23 }
  0x2f   :  { %1234 = vmatpush1.bf16.msra.mxu0 %v1875_v14  ;;  %1090 = vmatprep.mubr.f32.mxu0 %v27_v25 }
  0x30   :  { %1236 = vmatprep.subr.bf16.mxu0 %v1878_v15 }
  0x31   :  { %1210 = vmatpush1.bf16.msra.mxu1 %v2109_v48 }
  0x32   :  { %1212 = vmatprep.subr.bf16.mxu1 %v2113_v50  ;;  %1091 = vmatmul.mubr.f32.gmra.mrb[4].mxu0 %v28_v26 }
  0x33   :  { %1238 = vmatpush1.bf16.msra.mxu0 %v1893_v20  ;;  %1093 = vmatprep.mubr.f32.mxu0 %v29_v27 }
  0x34   :  { %1240 = vmatprep.subr.bf16.mxu0 %v1896_v21 }
  0x35   :  { %1214 = vmatpush1.bf16.msra.mxu1 %v2129_v56 }
  0x36   :  { %1216 = vmatprep.subr.bf16.mxu1 %v2133_v57  ;;  %1094 = vmatmul.mubr.f32.gmra.mrb[6].mxu0 %v30_v29 }
  0x37   :  { %1242 = vmatpush1.bf16.msra.mxu0 %v1917_v28  ;;  %373 = vmatprep.mubr.f32.mxu0 %v1798_v3 }
  0x38   :  { %1244 = vmatprep.subr.bf16.mxu0 %v1923_v31 }
  0x39   :  { %1218 = vmatpush1.bf16.msra.mxu1 %v2149_v0 }
  0x3a   :  { %1220 = vmatprep.subr.bf16.mxu1 %v2153_v1 }
  0x3b   :  { %1246 = vmatpush1.bf16.msra.mxu0 %v1947_v40 }
  0x3c   :  { %1248 = vmatprep.subr.bf16.mxu0 %v1953_v43 }
  0x3d   :  { %1222 = vmatpush1.bf16.msra.mxu1 %v2169_v12 }
  0x3e   :  { %1224 = vmatprep.subr.bf16.mxu1 %v2173_v13 }
  0x3f   :  { %1250 = vmatpush1.bf16.msra.mxu0 %v1971_v49 }
  0x40   :  { %1252 = vmatprep.subr.bf16.mxu0 %v1977_v52 }
  0x41   :  { %1226 = vmatpush1.bf16.msra.mxu1 %v2183_v18 }
  0x42   :  { %1292 = vmatprep.subr.bf16.mxu1 %v1846_v4 }
  0x43   :  { %1254 = vmatpush1.bf16.msra.mxu0 %v1995_v58 }
  0x44   :  { %301 = vmatmul.mubr.f32.vlgmr.msra.gmra.mrb[0].mxu1 %v1798_v3  ;;  %1256 = vmatprep.subr.bf16.mxu0 %v2001_v61 }
  0x45   :  { %1294 = vmatpush1.bf16.msra.mxu1 %v1857_v8 }
  0x46   :  { %1296 = vmatprep.subr.bf16.mxu1 %v1859_v9 }
  0x47   :  { %1258 = vmatpush1.bf16.msra.mxu0 %v2022_v6 }
  0x48   :  { %1260 = vmatprep.subr.bf16.mxu0 %v2028_v11 }
  0x49   :  { %1298 = vmatpush1.bf16.msra.mxu1 %v1875_v14 }
  0x4a   :  { %1300 = vmatprep.subr.bf16.mxu1 %v1878_v15 }
  0x4b   :  { %1262 = vmatpush1.bf16.msra.mxu0 %v2046_v19 }
  0x4c   :  { %1264 = vmatprep.subr.bf16.mxu0 %v2052_v24 }
  0x4d   :  { %1302 = vmatpush1.bf16.msra.mxu1 %v1893_v20 }
  0x4e   :  { %1304 = vmatprep.subr.bf16.mxu1 %v1896_v21 }
  0x4f   :  { %1266 = vmatpush1.bf16.msra.mxu0 %v2070_v32 }
  0x50   :  { %1268 = vmatprep.subr.bf16.mxu0 %v2073_v34 }
  0x51   :  { %1306 = vmatpush1.bf16.msra.mxu1 %v1917_v28 }
  0x52   :  { %1308 = vmatprep.subr.bf16.mxu1 %v1923_v31 }
  0x53   :  { %1270 = vmatpush1.bf16.msra.mxu0 %v2088_v39 }
  0x54   :  { %1272 = vmatprep.subr.bf16.mxu0 %v2091_v41 }
  0x55   :  { %1310 = vmatpush1.bf16.msra.mxu1 %v1947_v40 }
  0x56   :  { %1312 = vmatprep.subr.bf16.mxu1 %v1953_v43 }
  0x57   :  { %1274 = vmatpush1.bf16.msra.mxu0 %v2109_v48 }
  0x58   :  { %1276 = vmatprep.subr.bf16.mxu0 %v2113_v50 }
  0x59   :  { %1314 = vmatpush1.bf16.msra.mxu1 %v1971_v49 }
  0x5a   :  { %1316 = vmatprep.subr.bf16.mxu1 %v1977_v52 }
  0x5b   :  { %1278 = vmatpush1.bf16.msra.mxu0 %v2129_v56 }
  0x5c   :  { %1280 = vmatprep.subr.bf16.mxu0 %v2133_v57 }
  0x5d   :  { %1318 = vmatpush1.bf16.msra.mxu1 %v1995_v58 }
  0x5e   :  { %1320 = vmatprep.subr.bf16.mxu1 %v2001_v61 }
  0x5f   :  { %1282 = vmatpush1.bf16.msra.mxu0 %v2149_v0 }
  0x60   :  { %1284 = vmatprep.subr.bf16.mxu0 %v2153_v1 }
  0x61   :  { %1322 = vmatpush1.bf16.msra.mxu1 %v2022_v6 }
  0x62   :  { %1324 = vmatprep.subr.bf16.mxu1 %v2028_v11 }
  0x63   :  { %1286 = vmatpush1.bf16.msra.mxu0 %v2169_v12 }
  0x64   :  { %1288 = vmatprep.subr.bf16.mxu0 %v2173_v13 }
  0x65   :  { %1326 = vmatpush1.bf16.msra.mxu1 %v2046_v19 }
  0x66   :  { %1328 = vmatprep.subr.bf16.mxu1 %v2052_v24 }
  0x67   :  { %1290 = vmatpush1.bf16.msra.mxu0 %v2183_v18 }
  0x68   :  { %1356 = vmatprep.subr.bf16.mxu0 %v1846_v4 }
  0x69   :  { %1330 = vmatpush1.bf16.msra.mxu1 %v2070_v32 }
  0x6a   :  { %1332 = vmatprep.subr.bf16.mxu1 %v2073_v34 }
  0x6d   :  { %1334 = vmatpush1.bf16.msra.mxu1 %v2088_v39 }
  0x6e   :  { %1336 = vmatprep.subr.bf16.mxu1 %v2091_v41 }
  0x71   :  { %1338 = vmatpush1.bf16.msra.mxu1 %v2109_v48 }
  0x72   :  { %1340 = vmatprep.subr.bf16.mxu1 %v2113_v50 }
  0x75   :  { %1342 = vmatpush1.bf16.msra.mxu1 %v2129_v56 }
  0x76   :  { %1344 = vmatprep.subr.bf16.mxu1 %v2133_v57 }
  0x79   :  { %1346 = vmatpush1.bf16.msra.mxu1 %v2149_v0 }
  0x7a   :  { %1348 = vmatprep.subr.bf16.mxu1 %v2153_v1 }
  0x7d   :  { %1350 = vmatpush1.bf16.msra.mxu1 %v2169_v12 }
  0x7e   :  { %1352 = vmatprep.subr.bf16.mxu1 %v2173_v13 }
  0x81   :  { %1354 = vmatpush1.bf16.msra.mxu1 %v2183_v18 }
  0x82   :  { %1420 = vmatprep.subr.bf16.mxu1 %v1846_v4 }
  0xfd   :  { %v1086_v30 = vpop.f32.mrb[0].mxu0 }
  0xfe   :  { %v113_v33 = vpop.f32.mrb[1].mxu0 }
 0x101   :  { %v2303_v53 = vpop.f32.mrb[2].mxu0 }
 0x102   :  { %v123_v54 = vpop.f32.mrb[3].mxu0 }
 0x105   :  { %v2305_v55 = vpop.f32.mrb[4].mxu0 }
 0x106   :  { %v2307_v59 = vpop.f32.mrb[5].mxu0 }
 0x109   :  { %v2309_v60 = vpop.f32.mrb[6].mxu0 }
 0x10a   :  { %v2311_v62 = vpop.f32.mrb[7].mxu0 }
 0x117   :  { %v302_v44 = vpop.f32.mrb[0].mxu1 }
 0x118   :  { %v303_v45 = vadd.f32 %v302_v44, %v2268_v42  ;;  %v304_v46 = vpop.f32.mrb[1].mxu1 }
 0x11a   :  { %v307_v47 = vadd.f32 %v303_v45, %v113_v33 }
 0x11c   :  { %1766 = vtanh.f32 %v307_v47 }
 0x126   :  { %v1767_v51 = vpop.eup %1766 }
 0x127   :  { %374 = vmatmul.mubr.f32.vlgmr.msra.gmra.mrb[8].mxu0 %v1767_v51 }
 0x128   :  { %1358 = vmatpush1.bf16.msra.mxu0 %v1857_v8 }
 0x129   :  { %1360 = vmatprep.subr.bf16.mxu0 %v1859_v9 }
 0x12c   :  { %1362 = vmatpush1.bf16.msra.mxu0 %v1875_v14 }
 0x12d   :  { %1364 = vmatprep.subr.bf16.mxu0 %v1878_v15 }
 0x130   :  { %1366 = vmatpush1.bf16.msra.mxu0 %v1893_v20 }
 0x131   :  { %1368 = vmatprep.subr.bf16.mxu0 %v1896_v21 }
 0x134   :  { %1370 = vmatpush1.bf16.msra.mxu0 %v1917_v28 }
 0x135   :  { %1372 = vmatprep.subr.bf16.mxu0 %v1923_v31 }
 0x138   :  { %1374 = vmatpush1.bf16.msra.mxu0 %v1947_v40 }
 0x139   :  { %1376 = vmatprep.subr.bf16.mxu0 %v1953_v43 }
 0x13c   :  { %1378 = vmatpush1.bf16.msra.mxu0 %v1971_v49 }
 0x13d   :  { %1380 = vmatprep.subr.bf16.mxu0 %v1977_v52 }
 0x140   :  { %1382 = vmatpush1.bf16.msra.mxu0 %v1995_v58 }
 0x141   :  { %1384 = vmatprep.subr.bf16.mxu0 %v2001_v61 }
 0x144   :  { %1386 = vmatpush1.bf16.msra.mxu0 %v2022_v6 }
 0x145   :  { %1388 = vmatprep.subr.bf16.mxu0 %v2028_v11 }
 0x148   :  { %1390 = vmatpush1.bf16.msra.mxu0 %v2046_v19 }
 0x149   :  { %1392 = vmatprep.subr.bf16.mxu0 %v2052_v24 }
 0x14c   :  { %1394 = vmatpush1.bf16.msra.mxu0 %v2070_v32 }
 0x14d   :  { %1396 = vmatprep.subr.bf16.mxu0 %v2073_v34 }
 0x150   :  { %1398 = vmatpush1.bf16.msra.mxu0 %v2088_v39 }
 0x151   :  { %1400 = vmatprep.subr.bf16.mxu0 %v2091_v41 }
 0x154   :  { %1402 = vmatpush1.bf16.msra.mxu0 %v2109_v48 }
 0x155   :  { %1404 = vmatprep.subr.bf16.mxu0 %v2113_v50 }
 0x158   :  { %1406 = vmatpush1.bf16.msra.mxu0 %v2129_v56 }
 0x159   :  { %1408 = vmatprep.subr.bf16.mxu0 %v2133_v57 }
 0x15c   :  { %1410 = vmatpush1.bf16.msra.mxu0 %v2149_v0 }
 0x15d   :  { %1412 = vmatprep.subr.bf16.mxu0 %v2153_v1 }
 0x160   :  { %1414 = vmatpush1.bf16.msra.mxu0 %v2169_v12 }
 0x161   :  { %1416 = vmatprep.subr.bf16.mxu0 %v2173_v13 }
 0x164   :  { %1418 = vmatpush1.bf16.msra.mxu0 %v2183_v18 }
 0x165   :  { %1484 = vmatprep.subr.bf16.mxu0 %v1846_v4 }
 0x1fa   :  { %v375_v5 = vpop.f32.mrb[8].mxu0 }
 0x1fb   :  { %v376_v7 = vadd.f32 %v375_v5, %v2268_v42  ;;  %v377_v10 = vpop.f32.mrb[9].mxu0 }
 0x1fc   :  { %v378_v16 = vadd.f32 %v377_v10, %v2313_v2 }
 0x1fd   :  { %v382_v17 = vadd.f32 %v1086_v30, %v376_v7 }
 0x1fe   :  { %1768 = vtanh.f32 %v378_v16 }
 0x1ff   :  { %1770 = vtanh.f32 %v382_v17 }
 0x208   :  { %v1769_v22 = vpop.eup %1768 }
 0x209   :  { %v1771_v23 = vpop.eup %1770  ;;  %449 = vmatprep.mubr.f32.mxu1 %v1769_v22 }
 0x20a   :  { %450 = vmatmul.mubr.f32.vlgmr.msra.gmra.mrb[2].mxu1 %v1771_v23 }
 0x20b   :  { %1422 = vmatpush1.bf16.msra.mxu1 %v1857_v8 }
 0x20c   :  { %1424 = vmatprep.subr.bf16.mxu1 %v1859_v9 }
 0x20f   :  { %1426 = vmatpush1.bf16.msra.mxu1 %v1875_v14 }
 0x210   :  { %1428 = vmatprep.subr.bf16.mxu1 %v1878_v15 }
 0x213   :  { %1430 = vmatpush1.bf16.msra.mxu1 %v1893_v20 }
 0x214   :  { %1432 = vmatprep.subr.bf16.mxu1 %v1896_v21 }
 0x217   :  { %1434 = vmatpush1.bf16.msra.mxu1 %v1917_v28 }
 0x218   :  { %1436 = vmatprep.subr.bf16.mxu1 %v1923_v31 }
 0x21b   :  { %1438 = vmatpush1.bf16.msra.mxu1 %v1947_v40 }
 0x21c   :  { %1440 = vmatprep.subr.bf16.mxu1 %v1953_v43 }
 0x21f   :  { %1442 = vmatpush1.bf16.msra.mxu1 %v1971_v49 }
 0x220   :  { %1444 = vmatprep.subr.bf16.mxu1 %v1977_v52 }
 0x223   :  { %1446 = vmatpush1.bf16.msra.mxu1 %v1995_v58 }
 0x224   :  { %1448 = vmatprep.subr.bf16.mxu1 %v2001_v61 }
 0x227   :  { %1450 = vmatpush1.bf16.msra.mxu1 %v2022_v6 }
 0x228   :  { %1452 = vmatprep.subr.bf16.mxu1 %v2028_v11 }
 0x22b   :  { %1454 = vmatpush1.bf16.msra.mxu1 %v2046_v19 }
 0x22c   :  { %1456 = vmatprep.subr.bf16.mxu1 %v2052_v24 }
 0x22f   :  { %1458 = vmatpush1.bf16.msra.mxu1 %v2070_v32 }
 0x230   :  { %1460 = vmatprep.subr.bf16.mxu1 %v2073_v34 }
 0x233   :  { %1462 = vmatpush1.bf16.msra.mxu1 %v2088_v39 }
 0x234   :  { %1464 = vmatprep.subr.bf16.mxu1 %v2091_v41 }
 0x237   :  { %1466 = vmatpush1.bf16.msra.mxu1 %v2109_v48 }
 0x238   :  { %1468 = vmatprep.subr.bf16.mxu1 %v2113_v50 }
 0x23b   :  { %1470 = vmatpush1.bf16.msra.mxu1 %v2129_v56 }
 0x23c   :  { %1472 = vmatprep.subr.bf16.mxu1 %v2133_v57 }
 0x23f   :  { %1474 = vmatpush1.bf16.msra.mxu1 %v2149_v0 }
 0x240   :  { %1476 = vmatprep.subr.bf16.mxu1 %v2153_v1 }
 0x243   :  { %1478 = vmatpush1.bf16.msra.mxu1 %v2169_v12 }
 0x244   :  { %1480 = vmatprep.subr.bf16.mxu1 %v2173_v13 }
 0x247   :  { %1482 = vmatpush1.bf16.msra.mxu1 %v2183_v18 }
 0x248   :  { %1548 = vmatprep.subr.bf16.mxu1 %v1846_v4 }
 0x2dd   :  { %v451_v25 = vpop.f32.mrb[2].mxu1 }
 0x2de   :  { %v452_v26 = vadd.f32 %v451_v25, %v2268_v42  ;;  %v453_v27 = vpop.f32.mrb[3].mxu1 }
 0x2df   :  { %v454_v29 = vadd.f32 %v453_v27, %v2313_v2  ;;  %v926_v27 = vld [vmem:[%s2552_s4 + $0x70] sm:$0xff] }
 0x2e0   :  { %v458_v30 = vadd.f32 %v452_v26, %v123_v54 }
 0x2e1   :  { %1772 = vtanh.f32 %v454_v29  ;;  %v927_v29 = vld [vmem:[%s2552_s4 + $0x78] sm:$0xff] }
 0x2e2   :  { %1774 = vtanh.f32 %v458_v30  ;;  %v1761_v30 = vpack.c.bf16 %v927_v29, %v926_v27 }
 0x2eb   :  { %v1773_v33 = vpop.eup %1772 }
 0x2ec   :  { %v1775_v35 = vpop.eup %1774  ;;  %525 = vmatprep.mubr.f32.mxu0 %v1773_v33 }
 0x2ed   :  { %526 = vmatmul.mubr.f32.vlgmr.msra.gmra.mrb[10].mxu0 %v1775_v35 }
 0x2ee   :  { %1486 = vmatpush1.bf16.msra.mxu0 %v1857_v8 }
 0x2ef   :  { %1488 = vmatprep.subr.bf16.mxu0 %v1859_v9 }
 0x2f2   :  { %1490 = vmatpush1.bf16.msra.mxu0 %v1875_v14 }
 0x2f3   :  { %1492 = vmatprep.subr.bf16.mxu0 %v1878_v15 }
 0x2f6   :  { %1494 = vmatpush1.bf16.msra.mxu0 %v1893_v20 }
 0x2f7   :  { %1496 = vmatprep.subr.bf16.mxu0 %v1896_v21 }
 0x2fa   :  { %1498 = vmatpush1.bf16.msra.mxu0 %v1917_v28 }
 0x2fb   :  { %1500 = vmatprep.subr.bf16.mxu0 %v1923_v31 }
 0x2fe   :  { %1502 = vmatpush1.bf16.msra.mxu0 %v1947_v40 }
 0x2ff   :  { %1504 = vmatprep.subr.bf16.mxu0 %v1953_v43 }
 0x302   :  { %1506 = vmatpush1.bf16.msra.mxu0 %v1971_v49 }
 0x303   :  { %1508 = vmatprep.subr.bf16.mxu0 %v1977_v52 }
 0x306   :  { %1510 = vmatpush1.bf16.msra.mxu0 %v1995_v58 }
 0x307   :  { %1512 = vmatprep.subr.bf16.mxu0 %v2001_v61 }
 0x30a   :  { %1514 = vmatpush1.bf16.msra.mxu0 %v2022_v6 }
 0x30b   :  { %1516 = vmatprep.subr.bf16.mxu0 %v2028_v11 }
 0x30e   :  { %1518 = vmatpush1.bf16.msra.mxu0 %v2046_v19 }
 0x30f   :  { %1520 = vmatprep.subr.bf16.mxu0 %v2052_v24 }
 0x312   :  { %1522 = vmatpush1.bf16.msra.mxu0 %v2070_v32 }
 0x313   :  { %1524 = vmatprep.subr.bf16.mxu0 %v2073_v34 }
 0x316   :  { %1526 = vmatpush1.bf16.msra.mxu0 %v2088_v39 }
 0x317   :  { %1528 = vmatprep.subr.bf16.mxu0 %v2091_v41 }
 0x31a   :  { %1530 = vmatpush1.bf16.msra.mxu0 %v2109_v48 }
 0x31b   :  { %1532 = vmatprep.subr.bf16.mxu0 %v2113_v50 }
 0x31e   :  { %1534 = vmatpush1.bf16.msra.mxu0 %v2129_v56 }
 0x31f   :  { %1536 = vmatprep.subr.bf16.mxu0 %v2133_v57 }
 0x322   :  { %1538 = vmatpush1.bf16.msra.mxu0 %v2149_v0 }
 0x323   :  { %1540 = vmatprep.subr.bf16.mxu0 %v2153_v1 }
 0x326   :  { %1542 = vmatpush1.bf16.msra.mxu0 %v2169_v12 }
 0x327   :  { %1544 = vmatprep.subr.bf16.mxu0 %v2173_v13 }
 0x32a   :  { %1546 = vmatpush1.bf16.msra.mxu0 %v2183_v18 }
 0x32b   :  { %1612 = vmatprep.subr.bf16.mxu0 %v1846_v4 }
 0x3c0   :  { %v527_v36 = vpop.f32.mrb[10].mxu0 }
 0x3c1   :  { %v528_v37 = vadd.f32 %v527_v36, %v2268_v42  ;;  %v529_v38 = vpop.f32.mrb[11].mxu0 }
 0x3c2   :  { %v530_v44 = vadd.f32 %v529_v38, %v2313_v2  ;;  %v1010_v38 = vld [vmem:[%s2553_s5] ss:$0 sm:$0xff] }
 0x3c3   :  { %v534_v45 = vadd.f32 %v2303_v53, %v528_v37 }
 0x3c4   :  { %1776 = vtanh.f32 %v530_v44 }
 0x3c5   :  { %1778 = vtanh.f32 %v534_v45 }
 0x3ce   :  { %v1777_v46 = vpop.eup %1776 }
 0x3cf   :  { %v1779_v47 = vpop.eup %1778  ;;  %601 = vmatprep.mubr.f32.mxu1 %v1777_v46 }
 0x3d0   :  { %602 = vmatmul.mubr.f32.vlgmr.msra.gmra.mrb[4].mxu1 %v1779_v47 }
 0x3d1   :  { %1550 = vmatpush1.bf16.msra.mxu1 %v1857_v8 }
 0x3d2   :  { %1552 = vmatprep.subr.bf16.mxu1 %v1859_v9 }
 0x3d5   :  { %1554 = vmatpush1.bf16.msra.mxu1 %v1875_v14 }
 0x3d6   :  { %1556 = vmatprep.subr.bf16.mxu1 %v1878_v15 }
 0x3d9   :  { %1558 = vmatpush1.bf16.msra.mxu1 %v1893_v20 }
 0x3da   :  { %1560 = vmatprep.subr.bf16.mxu1 %v1896_v21 }
 0x3dd   :  { %1562 = vmatpush1.bf16.msra.mxu1 %v1917_v28 }
 0x3de   :  { %1564 = vmatprep.subr.bf16.mxu1 %v1923_v31 }
 0x3e1   :  { %1566 = vmatpush1.bf16.msra.mxu1 %v1947_v40 }
 0x3e2   :  { %1568 = vmatprep.subr.bf16.mxu1 %v1953_v43 }
 0x3e5   :  { %1570 = vmatpush1.bf16.msra.mxu1 %v1971_v49 }
 0x3e6   :  { %1572 = vmatprep.subr.bf16.mxu1 %v1977_v52 }
 0x3e9   :  { %1574 = vmatpush1.bf16.msra.mxu1 %v1995_v58 }
 0x3ea   :  { %1576 = vmatprep.subr.bf16.mxu1 %v2001_v61 }
 0x3ed   :  { %1578 = vmatpush1.bf16.msra.mxu1 %v2022_v6 }
 0x3ee   :  { %1580 = vmatprep.subr.bf16.mxu1 %v2028_v11 }
 0x3f1   :  { %1582 = vmatpush1.bf16.msra.mxu1 %v2046_v19 }
 0x3f2   :  { %1584 = vmatprep.subr.bf16.mxu1 %v2052_v24 }
 0x3f5   :  { %1586 = vmatpush1.bf16.msra.mxu1 %v2070_v32 }
 0x3f6   :  { %1588 = vmatprep.subr.bf16.mxu1 %v2073_v34 }
 0x3f9   :  { %1590 = vmatpush1.bf16.msra.mxu1 %v2088_v39 }
 0x3fa   :  { %1592 = vmatprep.subr.bf16.mxu1 %v2091_v41 }
 0x3fd   :  { %1594 = vmatpush1.bf16.msra.mxu1 %v2109_v48 }
 0x3fe   :  { %1596 = vmatprep.subr.bf16.mxu1 %v2113_v50 }
 0x401   :  { %1598 = vmatpush1.bf16.msra.mxu1 %v2129_v56 }
 0x402   :  { %1600 = vmatprep.subr.bf16.mxu1 %v2133_v57 }
 0x405   :  { %1602 = vmatpush1.bf16.msra.mxu1 %v2149_v0 }
 0x406   :  { %1604 = vmatprep.subr.bf16.mxu1 %v2153_v1 }
 0x409   :  { %1606 = vmatpush1.bf16.msra.mxu1 %v2169_v12 }
 0x40a   :  { %1608 = vmatprep.subr.bf16.mxu1 %v2173_v13 }
 0x40d   :  { %1610 = vmatpush1.bf16.msra.mxu1 %v2183_v18 }
 0x40e   :  { %1676 = vmatprep.subr.bf16.mxu1 %v1846_v4 }
 0x4a3   :  { %v603_v51 = vpop.f32.mrb[4].mxu1 }
 0x4a4   :  { %v604_v53 = vadd.f32 %v603_v51, %v2268_v42  ;;  %v605_v54 = vpop.f32.mrb[5].mxu1 }
 0x4a5   :  { %v606_v63 = vadd.f32 %v605_v54, %v2313_v2 }
 0x4a6   :  { %v610_v5 = vadd.f32 %v604_v53, %v2307_v59 }
 0x4a7   :  { %1780 = vtanh.f32 %v606_v63 }
 0x4a8   :  { %1782 = vtanh.f32 %v610_v5 }
 0x4b1   :  { %v1781_v7 = vpop.eup %1780 }
 0x4b2   :  { %v1783_v10 = vpop.eup %1782  ;;  %677 = vmatprep.mubr.f32.mxu0 %v1781_v7 }
 0x4b3   :  { %678 = vmatmul.mubr.f32.vlgmr.msra.gmra.mrb[12].mxu0 %v1783_v10 }
 0x4b4   :  { %1614 = vmatpush1.bf16.msra.mxu0 %v1857_v8 }
 0x4b5   :  { %1616 = vmatprep.subr.bf16.mxu0 %v1859_v9 }
 0x4b8   :  { %1618 = vmatpush1.bf16.msra.mxu0 %v1875_v14 }
 0x4b9   :  { %1620 = vmatprep.subr.bf16.mxu0 %v1878_v15 }
 0x4bc   :  { %1622 = vmatpush1.bf16.msra.mxu0 %v1893_v20 }
 0x4bd   :  { %1624 = vmatprep.subr.bf16.mxu0 %v1896_v21 }
 0x4c0   :  { %1626 = vmatpush1.bf16.msra.mxu0 %v1917_v28 }
 0x4c1   :  { %1628 = vmatprep.subr.bf16.mxu0 %v1923_v31 }
 0x4c4   :  { %1630 = vmatpush1.bf16.msra.mxu0 %v1947_v40 }
 0x4c5   :  { %1632 = vmatprep.subr.bf16.mxu0 %v1953_v43 }
 0x4c8   :  { %1634 = vmatpush1.bf16.msra.mxu0 %v1971_v49 }
 0x4c9   :  { %1636 = vmatprep.subr.bf16.mxu0 %v1977_v52 }
 0x4cc   :  { %1638 = vmatpush1.bf16.msra.mxu0 %v1995_v58 }
 0x4cd   :  { %1640 = vmatprep.subr.bf16.mxu0 %v2001_v61 }
 0x4d0   :  { %1642 = vmatpush1.bf16.msra.mxu0 %v2022_v6 }
 0x4d1   :  { %1644 = vmatprep.subr.bf16.mxu0 %v2028_v11 }
 0x4d4   :  { %1646 = vmatpush1.bf16.msra.mxu0 %v2046_v19 }
 0x4d5   :  { %1648 = vmatprep.subr.bf16.mxu0 %v2052_v24 }
 0x4d8   :  { %1650 = vmatpush1.bf16.msra.mxu0 %v2070_v32 }
 0x4d9   :  { %1652 = vmatprep.subr.bf16.mxu0 %v2073_v34 }
 0x4dc   :  { %1654 = vmatpush1.bf16.msra.mxu0 %v2088_v39 }
 0x4dd   :  { %1656 = vmatprep.subr.bf16.mxu0 %v2091_v41 }
 0x4e0   :  { %1658 = vmatpush1.bf16.msra.mxu0 %v2109_v48 }
 0x4e1   :  { %1660 = vmatprep.subr.bf16.mxu0 %v2113_v50 }
 0x4e4   :  { %1662 = vmatpush1.bf16.msra.mxu0 %v2129_v56 }
 0x4e5   :  { %1664 = vmatprep.subr.bf16.mxu0 %v2133_v57 }
 0x4e8   :  { %1666 = vmatpush1.bf16.msra.mxu0 %v2149_v0 }
 0x4e9   :  { %1668 = vmatprep.subr.bf16.mxu0 %v2153_v1 }
 0x4ec   :  { %1670 = vmatpush1.bf16.msra.mxu0 %v2169_v12 }
 0x4ed   :  { %1672 = vmatprep.subr.bf16.mxu0 %v2173_v13 }
 0x4f0   :  { %1674 = vmatpush1.bf16.msra.mxu0 %v2183_v18 }
 0x586   :  { %v679_v4 = vpop.f32.mrb[12].mxu0 }
 0x587   :  { %v680_v59 = vadd.f32 %v679_v4, %v2268_v42  ;;  %v681_v16 = vpop.f32.mrb[13].mxu0 }
 0x588   :  { %v682_v17 = vadd.f32 %v681_v16, %v2313_v2 }
 0x589   :  { %v686_v22 = vadd.f32 %v2305_v55, %v680_v59 }
 0x58a   :  { %1784 = vtanh.f32 %v682_v17 }
 0x58b   :  { %1786 = vtanh.f32 %v686_v22 }
 0x594   :  { %v1785_v23 = vpop.eup %1784 }
 0x595   :  { %v1787_v25 = vpop.eup %1786  ;;  %753 = vmatprep.mubr.f32.mxu1 %v1785_v23 }
 0x596   :  { %754 = vmatmul.mubr.f32.vlgmr.msra.gmra.mrb[6].mxu1 %v1787_v25 }
 0x597   :  { %1678 = vmatpush1.bf16.msra.mxu1 %v1857_v8 }
 0x598   :  { %1680 = vmatprep.subr.bf16.mxu1 %v1859_v9 }
 0x59b   :  { %1682 = vmatpush1.bf16.msra.mxu1 %v1875_v14 }
 0x59c   :  { %1684 = vmatprep.subr.bf16.mxu1 %v1878_v15 }
 0x59f   :  { %1686 = vmatpush1.bf16.msra.mxu1 %v1893_v20 }
 0x5a0   :  { %1688 = vmatprep.subr.bf16.mxu1 %v1896_v21 }
 0x5a3   :  { %1690 = vmatpush1.bf16.msra.mxu1 %v1917_v28 }
 0x5a4   :  { %1692 = vmatprep.subr.bf16.mxu1 %v1923_v31  ;;  %v1799_v31 = vmov 0.0|0.0  }
 0x5a5   :  { %1739 = vmatprep.subr.bf16.mxu0 %v1799_v31 }
 0x5a7   :  { %1694 = vmatpush1.bf16.msra.mxu1 %v1947_v40  ;;  %v912_v40 = vld [vmem:[%s2552_s4] sm:$0xff] }
 0x5a8   :  { %1696 = vmatprep.subr.bf16.mxu1 %v1953_v43  ;;  %v913_v43 = vld [vmem:[%s2552_s4 + $0x8] sm:$0xff] }
 0x5ab   :  { %1698 = vmatpush1.bf16.msra.mxu1 %v1971_v49  ;;  %v914_v49 = vld [vmem:[%s2552_s4 + $0x10] sm:$0xff] }
 0x5ac   :  { %1700 = vmatprep.subr.bf16.mxu1 %v1977_v52  ;;  %v1740_v52 = vpack.c.bf16 %v913_v43, %v912_v40 }
 0x5af   :  { %1702 = vmatpush1.bf16.msra.mxu1 %v1995_v58  ;;  %v915_v58 = vld [vmem:[%s2552_s4 + $0x18] sm:$0xff] }
 0x5b0   :  { %1704 = vmatprep.subr.bf16.mxu1 %v2001_v61  ;;  %v1743_v61 = vpack.c.bf16 %v915_v58, %v914_v49 }
 0x5b3   :  { %1706 = vmatpush1.bf16.msra.mxu1 %v2022_v6  ;;  %v916_v6 = vld [vmem:[%s2552_s4 + $0x20] sm:$0xff] }
 0x5b4   :  { %1708 = vmatprep.subr.bf16.mxu1 %v2028_v11  ;;  %v917_v11 = vld [vmem:[%s2552_s4 + $0x28] sm:$0xff] }
 0x5b7   :  { %1710 = vmatpush1.bf16.msra.mxu1 %v2046_v19  ;;  %v1746_v19 = vpack.c.bf16 %v917_v11, %v916_v6 }
 0x5b8   :  { %1712 = vmatprep.subr.bf16.mxu1 %v2052_v24  ;;  %v918_v24 = vld [vmem:[%s2552_s4 + $0x30] sm:$0xff] }
 0x5bb   :  { %1714 = vmatpush1.bf16.msra.mxu1 %v2070_v32  ;;  %v919_v32 = vld [vmem:[%s2552_s4 + $0x38] sm:$0xff] }
 0x5bc   :  { %1716 = vmatprep.subr.bf16.mxu1 %v2073_v34  ;;  %v1749_v34 = vpack.c.bf16 %v919_v32, %v918_v24 }
 0x5bf   :  { %1718 = vmatpush1.bf16.msra.mxu1 %v2088_v39 }
 0x5c0   :  { %1720 = vmatprep.subr.bf16.mxu1 %v2091_v41 }
 0x5c3   :  { %1722 = vmatpush1.bf16.msra.mxu1 %v2109_v48 }
 0x5c4   :  { %1724 = vmatprep.subr.bf16.mxu1 %v2113_v50 }
 0x5c7   :  { %1726 = vmatpush1.bf16.msra.mxu1 %v2129_v56 }
 0x5c8   :  { %1728 = vmatprep.subr.bf16.mxu1 %v2133_v57 }
 0x5cb   :  { %1730 = vmatpush1.bf16.msra.mxu1 %v2149_v0 }
 0x5cc   :  { %1732 = vmatprep.subr.bf16.mxu1 %v2153_v1  ;;  %v920_v1 = vld [vmem:[%s2552_s4 + $0x40] sm:$0xff] }
 0x5cf   :  { %1734 = vmatpush1.bf16.msra.mxu1 %v2169_v12  ;;  %v921_v12 = vld [vmem:[%s2552_s4 + $0x48] sm:$0xff] }
 0x5d0   :  { %1736 = vmatprep.subr.bf16.mxu1 %v2173_v13  ;;  %v1752_v13 = vpack.c.bf16 %v921_v12, %v920_v1 }
 0x5d3   :  { %1738 = vmatpush1.bf16.msra.mxu1 %v2183_v18  ;;  %v922_v18 = vld [vmem:[%s2552_s4 + $0x50] sm:$0xff] }
 0x669   :  { %v755_v8 = vpop.f32.mrb[6].mxu1 }
 0x66a   :  { %v756_v9 = vadd.f32 %v755_v8, %v2268_v42  ;;  %v757_v14 = vpop.f32.mrb[7].mxu1 }
 0x66b   :  { %v758_v15 = vadd.f32 %v757_v14, %v2313_v2 }
 0x66c   :  { %v762_v20 = vadd.f32 %v756_v9, %v2311_v62  ;;  %v925_v62 = vld [vmem:[%s2552_s4 + $0x68] sm:$0xff] }
 0x66d   :  { %1788 = vtanh.f32 %v758_v15 }
 0x66e   :  { %1790 = vtanh.f32 %v762_v20 }
 0x677   :  { %v1789_v21 = vpop.eup %1788 }
 0x678   :  { %v1791_v28 = vpop.eup %1790  ;;  %829 = vmatprep.mubr.f32.mxu0 %v1789_v21 }
 0x679   :  { %830 = vmatmul.mubr.f32.vlgmr.msra.gmra.mrb[14].mxu0 %v1791_v28 }
 0x67a   :  { %1741 = vmatpush3.bf16.msra.mxu0 %v1740_v52  ;;  %1128 = vmatprep.mubr.msk.f32.mxu0 %vm1800_vm0, %v1798_v3 }
 0x67b   :  { %1742 = vmatprep.subr.bf16.mxu0 %v1799_v31 }
 0x67e   :  { %1744 = vmatpush3.bf16.msra.mxu0 %v1743_v61 }
 0x67f   :  { %1745 = vmatprep.subr.bf16.mxu0 %v1799_v31 }
 0x682   :  { %1747 = vmatpush3.bf16.msra.mxu0 %v1746_v19 }
 0x683   :  { %1748 = vmatprep.subr.bf16.mxu0 %v1799_v31 }
 0x686   :  { %1750 = vmatpush3.bf16.msra.mxu0 %v1749_v34 }
 0x687   :  { %1751 = vmatprep.subr.bf16.mxu0 %v1799_v31 }
 0x68a   :  { %1753 = vmatpush3.bf16.msra.mxu0 %v1752_v13 }
 0x68b   :  { %1754 = vmatprep.subr.bf16.mxu0 %v1799_v31 }
 0x74c   :  { %v831_v39 = vpop.f32.mrb[14].mxu0 }
 0x74d   :  { %v832_v41 = vadd.f32 %v831_v39, %v2268_v42  ;;  %v833_v48 = vpop.f32.mrb[15].mxu0  ;;  %v923_v42 = vld [vmem:[%s2552_s4 + $0x58] sm:$0xff] }
 0x74e   :  { %v834_v50 = vadd.f32 %v833_v48, %v2313_v2  ;;  %v1755_v55 = vpack.c.bf16 %v923_v42, %v922_v18 }
 0x74f   :  { %v838_v56 = vadd.f32 %v2309_v60, %v832_v41  ;;  %v924_v60 = vld [vmem:[%s2552_s4 + $0x60] sm:$0xff] }
 0x750   :  { %1792 = vtanh.f32 %v834_v50  ;;  %1756 = vmatpush3.bf16.msra.mxu0 %v1755_v55  ;;  %v1758_v26 = vpack.c.bf16 %v925_v62, %v924_v60 }
 0x751   :  { %1794 = vtanh.f32 %v838_v56  ;;  %1757 = vmatprep.subr.bf16.mxu0 %v1799_v31 }
 0x754   :  { %1759 = vmatpush3.bf16.msra.mxu0 %v1758_v26 }
 0x755   :  { %1760 = vmatprep.subr.bf16.mxu0 %v1799_v31 }
 0x758   :  { %1762 = vmatpush3.bf16.msra.mxu0 %v1761_v30 }
 0x75a   :  { %v1793_v57 = vpop.eup %1792 }
 0x75b   :  { %v1795_v0 = vpop.eup %1794  ;;  %905 = vmatprep.mubr.f32.mxu1 %v1793_v57 }
 0x75c   :  { %906 = vmatmul.mubr.f32.vlgmr.msra.gmra.mrb[8].mxu1 %v1795_v0 }
 0x82f   :  { %v907_v33 = vpop.f32.mrb[8].mxu1 }
 0x830   :  { %v908_v35 = vpop.f32.mrb[9].mxu1 }
 0x831   :  { %v909_v36 = vadd.f32 %v908_v35, %v2313_v2 }
 0x833   :  { %1796 = vtanh.f32 %v909_v36 }
 0x83d   :  { %v1797_v37 = vpop.eup %1796 }
 0x83e   :  { %1129 = vmatmul.mubr.f32.vlgmr.msra.gmra.mrb[16].mxu0 %v1797_v37 }
 0x911   :  { %v1001_v44 = vpop.f32.mrb[16].mxu0 }
 0x912   :  { %v1002_v45 = vadd.f32 %v1010_v38, %v1001_v44  ;;  %v1130_v46 = vpop.f32.mrb[17].mxu0 }
 0x914   :  { %1005 = vst [vmem:[%s2554_s6] sm:$0xff] %v1002_v45 }

</bundles_post_ra>
